<compile_context>
chip_gen: v5e
topology: v5e:2x2
jax: 0.10.0
libtpu: 0.0.40
codegen_flags: <defaults>
</compile_context>

<pallas_src>
import math

import jax
import jax.numpy as jnp
from jax import lax
from jax.experimental import pallas as pl
from jax.experimental.pallas import tpu as pltpu

D_MODEL = 32
N_HEADS = 4
D_FF = 4 * D_MODEL          # d_ff = d_ff or 4 * d_model
E_HEAD = D_MODEL // N_HEADS
LN_EPS = 1e-5
INV_SQRT_2PI = 1.0 / math.sqrt(2.0 * math.pi)
LN3 = math.log(3.0)


# ---------------------------------------------------------------------------
# Fused kernel: one batch element per grid point.
#   projections -> per-head anomaly attention (series/prior/sigma) ->
#   out-projection + residual + norm1 + 1x1-conv FFN + residual + norm2
# ---------------------------------------------------------------------------
def _encoder_layer_kernel(x_ref, dist2_ref, w_in_ref, b_in_ref,
                          wo_ref, bo_ref, g1_ref, be1_ref,
                          w1_ref, b1_ref, w2_ref, b2_ref, g2_ref, be2_ref,
                          out_ref, series_ref, prior_ref, sigma_ref,
                          acc_ref):
    D, H, E = D_MODEL, N_HEADS, E_HEAD

    x = x_ref[0, :, :]                          # (L, D)
    dist2 = dist2_ref[...]                      # (L, L)  precomputed |i-j|^2

    # ---- fused Q/K/V/sigma input projections: one (L,D) @ (D,3D+H) matmul --
    proj = jnp.dot(x, w_in_ref[...], preferred_element_type=jnp.float32) + b_in_ref[...]
    q = proj[:, 0:D]
    k = proj[:, D:2 * D]
    v = proj[:, 2 * D:3 * D]
    sig = proj[:, 3 * D:3 * D + H]              # (L, H)

    # sigma transform:  sigmoid(5*sigma)+1e-5 ; 3**sigma - 1
    sig_t = 1.0 / (1.0 + jnp.exp(-5.0 * sig)) + 1e-5
    sig_t = jnp.exp(sig_t * LN3) - 1.0          # (L, H)
    sigma_ref[0, :, :] = sig_t                  # compact output (B, L, H)

    scale = 1.0 / math.sqrt(E)

    # ---- per-head attention (H=4, statically unrolled; all VMEM-resident) --
    for h in range(H):
        lo, hi = h * E, (h + 1) * E
        qh = q[:, lo:hi]                        # (L, E)
        kh = k[:, lo:hi]
        vh = v[:, lo:hi]

        scores = jnp.einsum("qd,kd->qk", qh, kh,
                            preferred_element_type=jnp.float32) * scale  # (L, L)

        # softmax over keys (dropout on series is identity in eval mode)
        m = jnp.max(scores, axis=-1, keepdims=True)
        e = jnp.exp(scores - m)
        denom = jnp.sum(e, axis=-1, keepdims=True)
        series_h = e * pl.reciprocal(denom, approx=True)                 # (L, L)

        # series @ V, written into the concat buffer at this head's columns
        acc_ref[:, lo:hi] = jnp.dot(series_h, vh,
                                    preferred_element_type=jnp.float32)

        # Gaussian prior from sigma: one exact reciprocal per row, then muls
        inv_sig = 1.0 / sig_t[:, h:h + 1]                                # (L, 1)
        prior_h = (INV_SQRT_2PI * inv_sig) * jnp.exp(
            -dist2 * (0.5 * inv_sig * inv_sig))                          # (L, L)

        series_ref[0, h, :, :] = series_h
        prior_ref[0, h, :, :] = prior_h

    # ---- out-projection + residual + norm1 + conv1(1x1)/relu/conv2(1x1)
    #      + residual + norm2 ------------------------------------------------
    def layernorm(z, g, b):
        mu = jnp.mean(z, axis=-1, keepdims=True)
        var = jnp.mean((z - mu) * (z - mu), axis=-1, keepdims=True)
        return (z - mu) * lax.rsqrt(var + LN_EPS) * g + b

    attn_cat = acc_ref[...]                     # (L, D) concatenated heads
    new_x = jnp.dot(attn_cat, wo_ref[...],
                    preferred_element_type=jnp.float32) + bo_ref[...]
    xn = layernorm(x + new_x, g1_ref[...], be1_ref[...])          # norm1

    y = jnp.dot(xn, w1_ref[...], preferred_element_type=jnp.float32) + b1_ref[...]
    y = jnp.maximum(y, 0.0)                                        # relu
    y = jnp.dot(y, w2_ref[...], preferred_element_type=jnp.float32) + b2_ref[...]

    out_ref[0, :, :] = layernorm(xn + y, g2_ref[...], be2_ref[...])  # norm2


# ---------------------------------------------------------------------------
# Wrapper
# ---------------------------------------------------------------------------
def encoder_layer_forward(x, p, attn_mask=None):
    del attn_mask  # AnomalyAttention ignores attn_mask
    B, L, D = x.shape
    H = N_HEADS

    # |i-j|^2 distance matrix, identical for every (batch, head): build once.
    idx = jnp.arange(L, dtype=jnp.float32)
    dist2 = (idx[:, None] - idx[None, :]) ** 2                    # (L, L)

    # Fuse the four input projections into one weight/bias (D, 3D+H).
    w_in = jnp.concatenate([p["wq"], p["wk"], p["wv"], p["wsig"]], axis=1)
    b_in = jnp.concatenate([p["bq"], p["bk"], p["bv"], p["bsig"]], axis=1)

    full = lambda r, c: pl.BlockSpec((r, c), lambda b: (0, 0))

    out, series, prior, sig_lh = pl.pallas_call(
        _encoder_layer_kernel,
        grid=(B,),
        in_specs=[
            pl.BlockSpec((1, L, D), lambda b: (b, 0, 0)),   # x
            full(L, L),                                     # dist2
            full(D, 3 * D + H), full(1, 3 * D + H),         # fused in-proj
            full(D, D), full(1, D),                         # out-proj
            full(1, D), full(1, D),                         # norm1 gamma/beta
            full(D, D_FF), full(1, D_FF),                   # conv1 (1x1)
            full(D_FF, D), full(1, D),                      # conv2 (1x1)
            full(1, D), full(1, D),                         # norm2 gamma/beta
        ],
        out_specs=[
            pl.BlockSpec((1, L, D), lambda b: (b, 0, 0)),         # out
            pl.BlockSpec((1, H, L, L), lambda b: (b, 0, 0, 0)),   # series
            pl.BlockSpec((1, H, L, L), lambda b: (b, 0, 0, 0)),   # prior
            pl.BlockSpec((1, L, H), lambda b: (b, 0, 0)),         # sigma (compact)
        ],
        out_shape=(jax.ShapeDtypeStruct((B, L, D), jnp.float32),
                   jax.ShapeDtypeStruct((B, H, L, L), jnp.float32),
                   jax.ShapeDtypeStruct((B, H, L, L), jnp.float32),
                   jax.ShapeDtypeStruct((B, L, H), jnp.float32)),
        scratch_shapes=[pltpu.VMEM((L, D), jnp.float32)],         # head concat
        compiler_params=pltpu.CompilerParams(
            dimension_semantics=("parallel",)),
    )(x, dist2, w_in, b_in, p["wo"], p["bo"], p["g1"], p["be1"],
      p["w1"], p["b1"], p["w2"], p["b2"], p["g2"], p["be2"])

    # Module returns sigma repeated to (B, H, L, L); do the repeat as a cheap
    # lane-dense XLA broadcast instead of storing it from the kernel.
    sigma_mat = jnp.broadcast_to(
        jnp.transpose(sig_lh, (0, 2, 1))[..., None], (B, H, L, L))
    return out, series, prior, sigma_mat


# ---------------------------------------------------------------------------
# Pure-JAX reference (for correctness check)
# ---------------------------------------------------------------------------
def reference_forward(x, p):
    B, L, D = x.shape
    H, E = N_HEADS, D // N_HEADS

    def ln(z, g, b):
        mu = jnp.mean(z, axis=-1, keepdims=True)
        var = jnp.mean((z - mu) ** 2, axis=-1, keepdims=True)
        return (z - mu) / jnp.sqrt(var + LN_EPS) * g + b

    q = (x @ p["wq"] + p["bq"]).reshape(B, L, H, E)
    k = (x @ p["wk"] + p["bk"]).reshape(B, L, H, E)
    v = (x @ p["wv"] + p["bv"]).reshape(B, L, H, E)
    sig = (x @ p["wsig"] + p["bsig"]).reshape(B, L, H)

    scale = 1.0 / math.sqrt(E)
    scores = jnp.einsum("blhe,bshe->bhls", q, k) * scale
    series = jax.nn.softmax(scores, axis=-1)

    sig_t = jnp.transpose(sig, (0, 2, 1))
    sig_t = 1.0 / (1.0 + jnp.exp(-5.0 * sig_t)) + 1e-5
    sig_t = jnp.exp(sig_t * math.log(3.0)) - 1.0
    sigma_mat = jnp.broadcast_to(sig_t[..., None], (B, H, L, L))

    idx = jnp.arange(L, dtype=jnp.float32)
    dist = jnp.abs(idx[:, None] - idx[None, :])
    prior = 1.0 / (math.sqrt(2.0 * math.pi) * sigma_mat) * jnp.exp(
        -(dist ** 2) / (2.0 * sigma_mat ** 2))

    V = jnp.einsum("bhls,bshd->blhd", series, v).reshape(B, L, D)
    new_x = V @ p["wo"] + p["bo"]
    x1 = x + new_x
    xn = ln(x1, p["g1"], p["be1"])
    y = jax.nn.relu(xn @ p["w1"] + p["b1"]) @ p["w2"] + p["b2"]
    return ln(xn + y, p["g2"], p["be2"]), series, prior, sigma_mat


# ---------------------------------------------------------------------------
def init_params(key):
    ks = jax.random.split(key, 14)
    w = lambda k, shape, s=0.1: (s * jax.random.normal(k, shape)).astype(jnp.float32)
    D, H, F = D_MODEL, N_HEADS, D_FF
    return {
        # AttentionLayer projections (stored as (in, out) so kernels do x @ W)
        "wq": w(ks[0], (D, D)), "bq": w(ks[1], (1, D)),
        "wk": w(ks[2], (D, D)), "bk": w(ks[3], (1, D)),
        "wv": w(ks[4], (D, D)), "bv": w(ks[5], (1, D)),
        "wsig": w(ks[6], (D, H)), "bsig": w(ks[7], (1, H)),
        "wo": w(ks[8], (D, D)), "bo": w(ks[9], (1, D)),
        # LayerNorms (PyTorch default init: weight=1, bias=0)
        "g1": jnp.ones((1, D), jnp.float32), "be1": jnp.zeros((1, D), jnp.float32),
        "g2": jnp.ones((1, D), jnp.float32), "be2": jnp.zeros((1, D), jnp.float32),
        # conv1 (d_model -> d_ff, k=1) / conv2 (d_ff -> d_model, k=1) as matmuls
        "w1": w(ks[10], (D, F)), "b1": w(ks[11], (1, F)),
        "w2": w(ks[12], (F, D)), "b2": w(ks[13], (1, D)),
    }


if __name__ == "__main__":
    key = jax.random.PRNGKey(0)
    kx, kp = jax.random.split(key)
    B, L = 2, 16
    x = jax.random.normal(kx, (B, L, D_MODEL), dtype=jnp.float32)
    params = init_params(kp)

    fwd = jax.jit(encoder_layer_forward)
    outs = fwd(x, params)
    outs = jax.block_until_ready(outs)

    refs = reference_forward(x, params)
    names = ["out", "series(attn)", "prior(mask)", "sigma"]
    for name, a, b in zip(names, outs, refs):
        assert a.shape == b.shape, (name, a.shape, b.shape)
        err = float(jnp.max(jnp.abs(a - b)))
        assert jnp.allclose(a, b, rtol=5e-3, atol=5e-3), (name, err)

    print("KERNEL_OK")
</pallas_src>

<mosaic_0001>
module attributes {stable_mosaic.version = 11 : i64} {
  func.func @_encoder_layer_kernel(%arg0: i32, %arg1: memref<1x16x32xf32, #tpu.memory_space<vmem>>, %arg2: memref<16x16xf32, #tpu.memory_space<vmem>>, %arg3: memref<32x100xf32, #tpu.memory_space<vmem>>, %arg4: memref<1x100xf32, #tpu.memory_space<vmem>>, %arg5: memref<32x32xf32, #tpu.memory_space<vmem>>, %arg6: memref<1x32xf32, #tpu.memory_space<vmem>>, %arg7: memref<1x32xf32, #tpu.memory_space<vmem>>, %arg8: memref<1x32xf32, #tpu.memory_space<vmem>>, %arg9: memref<32x128xf32, #tpu.memory_space<vmem>>, %arg10: memref<1x128xf32, #tpu.memory_space<vmem>>, %arg11: memref<128x32xf32, #tpu.memory_space<vmem>>, %arg12: memref<1x32xf32, #tpu.memory_space<vmem>>, %arg13: memref<1x32xf32, #tpu.memory_space<vmem>>, %arg14: memref<1x32xf32, #tpu.memory_space<vmem>>, %arg15: memref<1x16x32xf32, #tpu.memory_space<vmem>>, %arg16: memref<1x4x16x16xf32, #tpu.memory_space<vmem>>, %arg17: memref<1x4x16x16xf32, #tpu.memory_space<vmem>>, %arg18: memref<1x16x4xf32, #tpu.memory_space<vmem>>, %arg19: memref<16x32xf32, #tpu.memory_space<vmem>>) attributes {dimension_semantics = [#tpu.dimension_semantics<parallel>], iteration_bounds = array<i64: 2>, scalar_prefetch = 0 : i64, scratch_operands = 1 : i64, tpu.core_type = #tpu.core_type<tc>, window_params = [{transform_indices = @transform_0, window_bounds = array<i64: 1, 16, 32>}, {pipeline_mode = #tpu.pipeline_mode<synchronous>, transform_indices = @transform_1, window_bounds = array<i64: 16, 16>}, {pipeline_mode = #tpu.pipeline_mode<synchronous>, transform_indices = @transform_2, window_bounds = array<i64: 32, 100>}, {pipeline_mode = #tpu.pipeline_mode<synchronous>, transform_indices = @transform_3, window_bounds = array<i64: 1, 100>}, {pipeline_mode = #tpu.pipeline_mode<synchronous>, transform_indices = @transform_4, window_bounds = array<i64: 32, 32>}, {pipeline_mode = #tpu.pipeline_mode<synchronous>, transform_indices = @transform_5, window_bounds = array<i64: 1, 32>}, {pipeline_mode = #tpu.pipeline_mode<synchronous>, transform_indices = @transform_6, window_bounds = array<i64: 1, 32>}, {pipeline_mode = #tpu.pipeline_mode<synchronous>, transform_indices = @transform_7, window_bounds = array<i64: 1, 32>}, {pipeline_mode = #tpu.pipeline_mode<synchronous>, transform_indices = @transform_8, window_bounds = array<i64: 32, 128>}, {pipeline_mode = #tpu.pipeline_mode<synchronous>, transform_indices = @transform_9, window_bounds = array<i64: 1, 128>}, {pipeline_mode = #tpu.pipeline_mode<synchronous>, transform_indices = @transform_10, window_bounds = array<i64: 128, 32>}, {pipeline_mode = #tpu.pipeline_mode<synchronous>, transform_indices = @transform_11, window_bounds = array<i64: 1, 32>}, {pipeline_mode = #tpu.pipeline_mode<synchronous>, transform_indices = @transform_12, window_bounds = array<i64: 1, 32>}, {pipeline_mode = #tpu.pipeline_mode<synchronous>, transform_indices = @transform_13, window_bounds = array<i64: 1, 32>}, {transform_indices = @transform_14, window_bounds = array<i64: 1, 16, 32>}, {transform_indices = @transform_15, window_bounds = array<i64: 1, 4, 16, 16>}, {transform_indices = @transform_16, window_bounds = array<i64: 1, 4, 16, 16>}, {transform_indices = @transform_17, window_bounds = array<i64: 1, 16, 4>}]} {
    %c0 = arith.constant 0 : index
    %c0_0 = arith.constant 0 : index
    %c0_1 = arith.constant 0 : index
    %0 = vector.load %arg1[%c0, %c0_0, %c0_1] : memref<1x16x32xf32, #tpu.memory_space<vmem>>, vector<1x16x32xf32>
    %1 = vector.shape_cast %0 : vector<1x16x32xf32> to vector<16x32xf32>
    %c0_2 = arith.constant 0 : index
    %c0_3 = arith.constant 0 : index
    %2 = vector.load %arg2[%c0_2, %c0_3] : memref<16x16xf32, #tpu.memory_space<vmem>>, vector<16x16xf32>
    %c0_4 = arith.constant 0 : index
    %c0_5 = arith.constant 0 : index
    %3 = vector.load %arg3[%c0_4, %c0_5] : memref<32x100xf32, #tpu.memory_space<vmem>>, vector<32x100xf32>
    %cst = arith.constant dense<0.000000e+00> : vector<16x100xf32>
    %4 = tpu.matmul %1, %3, %cst {dimension_numbers = #tpu.dot_dimension_numbers<[1], [0], [0], [1], [0, 0, 1, 1], [], []>} : vector<16x32xf32>, vector<32x100xf32>, vector<16x100xf32> -> vector<16x100xf32>
    %c0_6 = arith.constant 0 : index
    %c0_7 = arith.constant 0 : index
    %5 = vector.load %arg4[%c0_6, %c0_7] : memref<1x100xf32, #tpu.memory_space<vmem>>, vector<1x100xf32>
    %6 = vector.broadcast %5 : vector<1x100xf32> to vector<16x100xf32>
    %7 = arith.addf %4, %6 : vector<16x100xf32>
    %8 = vector.extract_strided_slice %7 {offsets = [0, 0], sizes = [16, 32], strides = [1, 1]} : vector<16x100xf32> to vector<16x32xf32>
    %9 = vector.extract_strided_slice %7 {offsets = [0, 32], sizes = [16, 32], strides = [1, 1]} : vector<16x100xf32> to vector<16x32xf32>
    %10 = vector.extract_strided_slice %7 {offsets = [0, 64], sizes = [16, 32], strides = [1, 1]} : vector<16x100xf32> to vector<16x32xf32>
    %11 = vector.extract_strided_slice %7 {offsets = [0, 96], sizes = [16, 4], strides = [1, 1]} : vector<16x100xf32> to vector<16x4xf32>
    %cst_8 = arith.constant -5.000000e+00 : f32
    %12 = vector.broadcast %cst_8 : f32 to vector<16x4xf32>
    %13 = arith.mulf %12, %11 : vector<16x4xf32>
    %14 = math.exp %13 : vector<16x4xf32>
    %cst_9 = arith.constant 1.000000e+00 : f32
    %15 = vector.broadcast %cst_9 : f32 to vector<16x4xf32>
    %16 = arith.addf %15, %14 : vector<16x4xf32>
    %cst_10 = arith.constant 1.000000e+00 : f32
    %17 = vector.broadcast %cst_10 : f32 to vector<16x4xf32>
    %18 = arith.divf %17, %16 : vector<16x4xf32>
    %cst_11 = arith.constant 9.99999974E-6 : f32
    %19 = vector.broadcast %cst_11 : f32 to vector<16x4xf32>
    %20 = arith.addf %18, %19 : vector<16x4xf32>
    %cst_12 = arith.constant 1.09861231 : f32
    %21 = vector.broadcast %cst_12 : f32 to vector<16x4xf32>
    %22 = arith.mulf %20, %21 : vector<16x4xf32>
    %23 = math.exp %22 : vector<16x4xf32>
    %cst_13 = arith.constant 1.000000e+00 : f32
    %24 = vector.broadcast %cst_13 : f32 to vector<16x4xf32>
    %25 = arith.subf %23, %24 : vector<16x4xf32>
    %c0_14 = arith.constant 0 : index
    %c0_15 = arith.constant 0 : index
    %c0_16 = arith.constant 0 : index
    %26 = vector.load %arg18[%c0_14, %c0_15, %c0_16] : memref<1x16x4xf32, #tpu.memory_space<vmem>>, vector<1x16x4xf32>
    %27 = vector.shape_cast %26 : vector<1x16x4xf32> to vector<16x4xf32>
    %28 = vector.shape_cast %25 : vector<16x4xf32> to vector<1x16x4xf32>
    tpu.vector_store %arg18[%c0_14, %c0_15, %c0_16], %28 {strides = array<i32>} : memref<1x16x4xf32, #tpu.memory_space<vmem>>, vector<1x16x4xf32>,
    %29 = vector.extract_strided_slice %8 {offsets = [0, 0], sizes = [16, 8], strides = [1, 1]} : vector<16x32xf32> to vector<16x8xf32>
    %30 = vector.extract_strided_slice %9 {offsets = [0, 0], sizes = [16, 8], strides = [1, 1]} : vector<16x32xf32> to vector<16x8xf32>
    %31 = vector.extract_strided_slice %10 {offsets = [0, 0], sizes = [16, 8], strides = [1, 1]} : vector<16x32xf32> to vector<16x8xf32>
    "tpu.trace_start"() <{level = 10 : i32, message = "qd,kd->qk"}> : () -> ()
    %cst_17 = arith.constant dense<0.000000e+00> : vector<16x16xf32>
    %32 = tpu.matmul %29, %30, %cst_17 {dimension_numbers = #tpu.dot_dimension_numbers<[1], [1], [0], [0], [0, 0, 1, 0], [], []>} : vector<16x8xf32>, vector<16x8xf32>, vector<16x16xf32> -> vector<16x16xf32>
    "tpu.trace_stop"() : () -> ()
    %cst_18 = arith.constant 0.353553385 : f32
    %33 = vector.broadcast %cst_18 : f32 to vector<16x16xf32>
    %34 = arith.mulf %32, %33 : vector<16x16xf32>
    %cst_19 = arith.constant dense<0xFF800000> : vector<16xf32>
    %35 = vector.multi_reduction <maximumf>, %34, %cst_19 [1] : vector<16x16xf32> to vector<16xf32>
    %36 = vector.shape_cast %35 : vector<16xf32> to vector<16x1xf32>
    %37 = vector.broadcast %36 : vector<16x1xf32> to vector<16x16xf32>
    %38 = arith.subf %34, %37 : vector<16x16xf32>
    %39 = math.exp %38 : vector<16x16xf32>
    %cst_20 = arith.constant dense<0.000000e+00> : vector<16xf32>
    %40 = vector.multi_reduction <add>, %39, %cst_20 [1] : vector<16x16xf32> to vector<16xf32>
    %41 = vector.shape_cast %40 : vector<16xf32> to vector<16x1xf32>
    %42 = tpu.reciprocal %41 {approx = true} : vector<16x1xf32> -> vector<16x1xf32>
    %43 = vector.broadcast %42 : vector<16x1xf32> to vector<16x16xf32>
    %44 = arith.mulf %39, %43 : vector<16x16xf32>
    %cst_21 = arith.constant dense<0.000000e+00> : vector<16x8xf32>
    %45 = tpu.matmul %44, %31, %cst_21 {dimension_numbers = #tpu.dot_dimension_numbers<[1], [0], [0], [1], [0, 0, 1, 1], [], []>} : vector<16x16xf32>, vector<16x8xf32>, vector<16x8xf32> -> vector<16x8xf32>
    %c0_22 = arith.constant 0 : index
    %c0_23 = arith.constant 0 : index
    %46 = vector.load %arg19[%c0_22, %c0_23] : memref<16x32xf32, #tpu.memory_space<vmem>>, vector<16x8xf32>
    tpu.vector_store %arg19[%c0_22, %c0_23], %45 {strides = array<i32>} : memref<16x32xf32, #tpu.memory_space<vmem>>, vector<16x8xf32>,
    %47 = vector.extract_strided_slice %25 {offsets = [0, 0], sizes = [16, 1], strides = [1, 1]} : vector<16x4xf32> to vector<16x1xf32>
    %cst_24 = arith.constant 1.000000e+00 : f32
    %48 = vector.broadcast %cst_24 : f32 to vector<16x1xf32>
    %49 = arith.divf %48, %47 : vector<16x1xf32>
    %cst_25 = arith.constant 0.398942292 : f32
    %50 = vector.broadcast %cst_25 : f32 to vector<16x1xf32>
    %51 = arith.mulf %50, %49 : vector<16x1xf32>
    %cst_26 = arith.constant 0.000000e+00 : f32
    %52 = vector.broadcast %cst_26 : f32 to vector<16x16xf32>
    %53 = arith.subf %52, %2 : vector<16x16xf32>
    %cst_27 = arith.constant 5.000000e-01 : f32
    %54 = vector.broadcast %cst_27 : f32 to vector<16x1xf32>
    %55 = arith.mulf %54, %49 : vector<16x1xf32>
    %56 = arith.mulf %55, %49 : vector<16x1xf32>
    %57 = vector.broadcast %56 : vector<16x1xf32> to vector<16x16xf32>
    %58 = arith.mulf %53, %57 : vector<16x16xf32>
    %59 = math.exp %58 : vector<16x16xf32>
    %60 = vector.broadcast %51 : vector<16x1xf32> to vector<16x16xf32>
    %61 = arith.mulf %60, %59 : vector<16x16xf32>
    %c0_28 = arith.constant 0 : index
    %c0_29 = arith.constant 0 : index
    %c0_30 = arith.constant 0 : index
    %c0_31 = arith.constant 0 : index
    %62 = vector.load %arg16[%c0_28, %c0_29, %c0_30, %c0_31] : memref<1x4x16x16xf32, #tpu.memory_space<vmem>>, vector<1x1x16x16xf32>
    %63 = vector.shape_cast %62 : vector<1x1x16x16xf32> to vector<16x16xf32>
    %64 = vector.shape_cast %44 : vector<16x16xf32> to vector<1x1x16x16xf32>
    tpu.vector_store %arg16[%c0_28, %c0_29, %c0_30, %c0_31], %64 {strides = array<i32>} : memref<1x4x16x16xf32, #tpu.memory_space<vmem>>, vector<1x1x16x16xf32>,
    %c0_32 = arith.constant 0 : index
    %c0_33 = arith.constant 0 : index
    %c0_34 = arith.constant 0 : index
    %c0_35 = arith.constant 0 : index
    %65 = vector.load %arg17[%c0_32, %c0_33, %c0_34, %c0_35] : memref<1x4x16x16xf32, #tpu.memory_space<vmem>>, vector<1x1x16x16xf32>
    %66 = vector.shape_cast %65 : vector<1x1x16x16xf32> to vector<16x16xf32>
    %67 = vector.shape_cast %61 : vector<16x16xf32> to vector<1x1x16x16xf32>
    tpu.vector_store %arg17[%c0_32, %c0_33, %c0_34, %c0_35], %67 {strides = array<i32>} : memref<1x4x16x16xf32, #tpu.memory_space<vmem>>, vector<1x1x16x16xf32>,
    %68 = vector.extract_strided_slice %8 {offsets = [0, 8], sizes = [16, 8], strides = [1, 1]} : vector<16x32xf32> to vector<16x8xf32>
    %69 = vector.extract_strided_slice %9 {offsets = [0, 8], sizes = [16, 8], strides = [1, 1]} : vector<16x32xf32> to vector<16x8xf32>
    %70 = vector.extract_strided_slice %10 {offsets = [0, 8], sizes = [16, 8], strides = [1, 1]} : vector<16x32xf32> to vector<16x8xf32>
    "tpu.trace_start"() <{level = 10 : i32, message = "qd,kd->qk"}> : () -> ()
    %cst_36 = arith.constant dense<0.000000e+00> : vector<16x16xf32>
    %71 = tpu.matmul %68, %69, %cst_36 {dimension_numbers = #tpu.dot_dimension_numbers<[1], [1], [0], [0], [0, 0, 1, 0], [], []>} : vector<16x8xf32>, vector<16x8xf32>, vector<16x16xf32> -> vector<16x16xf32>
    "tpu.trace_stop"() : () -> ()
    %cst_37 = arith.constant 0.353553385 : f32
    %72 = vector.broadcast %cst_37 : f32 to vector<16x16xf32>
    %73 = arith.mulf %71, %72 : vector<16x16xf32>
    %cst_38 = arith.constant dense<0xFF800000> : vector<16xf32>
    %74 = vector.multi_reduction <maximumf>, %73, %cst_38 [1] : vector<16x16xf32> to vector<16xf32>
    %75 = vector.shape_cast %74 : vector<16xf32> to vector<16x1xf32>
    %76 = vector.broadcast %75 : vector<16x1xf32> to vector<16x16xf32>
    %77 = arith.subf %73, %76 : vector<16x16xf32>
    %78 = math.exp %77 : vector<16x16xf32>
    %cst_39 = arith.constant dense<0.000000e+00> : vector<16xf32>
    %79 = vector.multi_reduction <add>, %78, %cst_39 [1] : vector<16x16xf32> to vector<16xf32>
    %80 = vector.shape_cast %79 : vector<16xf32> to vector<16x1xf32>
    %81 = tpu.reciprocal %80 {approx = true} : vector<16x1xf32> -> vector<16x1xf32>
    %82 = vector.broadcast %81 : vector<16x1xf32> to vector<16x16xf32>
    %83 = arith.mulf %78, %82 : vector<16x16xf32>
    %cst_40 = arith.constant dense<0.000000e+00> : vector<16x8xf32>
    %84 = tpu.matmul %83, %70, %cst_40 {dimension_numbers = #tpu.dot_dimension_numbers<[1], [0], [0], [1], [0, 0, 1, 1], [], []>} : vector<16x16xf32>, vector<16x8xf32>, vector<16x8xf32> -> vector<16x8xf32>
    %c0_41 = arith.constant 0 : index
    %c8 = arith.constant 8 : index
    %85 = vector.load %arg19[%c0_41, %c8] : memref<16x32xf32, #tpu.memory_space<vmem>>, vector<16x8xf32>
    tpu.vector_store %arg19[%c0_41, %c8], %84 {strides = array<i32>} : memref<16x32xf32, #tpu.memory_space<vmem>>, vector<16x8xf32>,
    %86 = vector.extract_strided_slice %25 {offsets = [0, 1], sizes = [16, 1], strides = [1, 1]} : vector<16x4xf32> to vector<16x1xf32>
    %cst_42 = arith.constant 1.000000e+00 : f32
    %87 = vector.broadcast %cst_42 : f32 to vector<16x1xf32>
    %88 = arith.divf %87, %86 : vector<16x1xf32>
    %cst_43 = arith.constant 0.398942292 : f32
    %89 = vector.broadcast %cst_43 : f32 to vector<16x1xf32>
    %90 = arith.mulf %89, %88 : vector<16x1xf32>
    %cst_44 = arith.constant 0.000000e+00 : f32
    %91 = vector.broadcast %cst_44 : f32 to vector<16x16xf32>
    %92 = arith.subf %91, %2 : vector<16x16xf32>
    %cst_45 = arith.constant 5.000000e-01 : f32
    %93 = vector.broadcast %cst_45 : f32 to vector<16x1xf32>
    %94 = arith.mulf %93, %88 : vector<16x1xf32>
    %95 = arith.mulf %94, %88 : vector<16x1xf32>
    %96 = vector.broadcast %95 : vector<16x1xf32> to vector<16x16xf32>
    %97 = arith.mulf %92, %96 : vector<16x16xf32>
    %98 = math.exp %97 : vector<16x16xf32>
    %99 = vector.broadcast %90 : vector<16x1xf32> to vector<16x16xf32>
    %100 = arith.mulf %99, %98 : vector<16x16xf32>
    %c0_46 = arith.constant 0 : index
    %c1 = arith.constant 1 : index
    %c0_47 = arith.constant 0 : index
    %c0_48 = arith.constant 0 : index
    %101 = vector.load %arg16[%c0_46, %c1, %c0_47, %c0_48] : memref<1x4x16x16xf32, #tpu.memory_space<vmem>>, vector<1x1x16x16xf32>
    %102 = vector.shape_cast %101 : vector<1x1x16x16xf32> to vector<16x16xf32>
    %103 = vector.shape_cast %83 : vector<16x16xf32> to vector<1x1x16x16xf32>
    tpu.vector_store %arg16[%c0_46, %c1, %c0_47, %c0_48], %103 {strides = array<i32>} : memref<1x4x16x16xf32, #tpu.memory_space<vmem>>, vector<1x1x16x16xf32>,
    %c0_49 = arith.constant 0 : index
    %c1_50 = arith.constant 1 : index
    %c0_51 = arith.constant 0 : index
    %c0_52 = arith.constant 0 : index
    %104 = vector.load %arg17[%c0_49, %c1_50, %c0_51, %c0_52] : memref<1x4x16x16xf32, #tpu.memory_space<vmem>>, vector<1x1x16x16xf32>
    %105 = vector.shape_cast %104 : vector<1x1x16x16xf32> to vector<16x16xf32>
    %106 = vector.shape_cast %100 : vector<16x16xf32> to vector<1x1x16x16xf32>
    tpu.vector_store %arg17[%c0_49, %c1_50, %c0_51, %c0_52], %106 {strides = array<i32>} : memref<1x4x16x16xf32, #tpu.memory_space<vmem>>, vector<1x1x16x16xf32>,
    %107 = vector.extract_strided_slice %8 {offsets = [0, 16], sizes = [16, 8], strides = [1, 1]} : vector<16x32xf32> to vector<16x8xf32>
    %108 = vector.extract_strided_slice %9 {offsets = [0, 16], sizes = [16, 8], strides = [1, 1]} : vector<16x32xf32> to vector<16x8xf32>
    %109 = vector.extract_strided_slice %10 {offsets = [0, 16], sizes = [16, 8], strides = [1, 1]} : vector<16x32xf32> to vector<16x8xf32>
    "tpu.trace_start"() <{level = 10 : i32, message = "qd,kd->qk"}> : () -> ()
    %cst_53 = arith.constant dense<0.000000e+00> : vector<16x16xf32>
    %110 = tpu.matmul %107, %108, %cst_53 {dimension_numbers = #tpu.dot_dimension_numbers<[1], [1], [0], [0], [0, 0, 1, 0], [], []>} : vector<16x8xf32>, vector<16x8xf32>, vector<16x16xf32> -> vector<16x16xf32>
    "tpu.trace_stop"() : () -> ()
    %cst_54 = arith.constant 0.353553385 : f32
    %111 = vector.broadcast %cst_54 : f32 to vector<16x16xf32>
    %112 = arith.mulf %110, %111 : vector<16x16xf32>
    %cst_55 = arith.constant dense<0xFF800000> : vector<16xf32>
    %113 = vector.multi_reduction <maximumf>, %112, %cst_55 [1] : vector<16x16xf32> to vector<16xf32>
    %114 = vector.shape_cast %113 : vector<16xf32> to vector<16x1xf32>
    %115 = vector.broadcast %114 : vector<16x1xf32> to vector<16x16xf32>
    %116 = arith.subf %112, %115 : vector<16x16xf32>
    %117 = math.exp %116 : vector<16x16xf32>
    %cst_56 = arith.constant dense<0.000000e+00> : vector<16xf32>
    %118 = vector.multi_reduction <add>, %117, %cst_56 [1] : vector<16x16xf32> to vector<16xf32>
    %119 = vector.shape_cast %118 : vector<16xf32> to vector<16x1xf32>
    %120 = tpu.reciprocal %119 {approx = true} : vector<16x1xf32> -> vector<16x1xf32>
    %121 = vector.broadcast %120 : vector<16x1xf32> to vector<16x16xf32>
    %122 = arith.mulf %117, %121 : vector<16x16xf32>
    %cst_57 = arith.constant dense<0.000000e+00> : vector<16x8xf32>
    %123 = tpu.matmul %122, %109, %cst_57 {dimension_numbers = #tpu.dot_dimension_numbers<[1], [0], [0], [1], [0, 0, 1, 1], [], []>} : vector<16x16xf32>, vector<16x8xf32>, vector<16x8xf32> -> vector<16x8xf32>
    %c0_58 = arith.constant 0 : index
    %c16 = arith.constant 16 : index
    %124 = vector.load %arg19[%c0_58, %c16] : memref<16x32xf32, #tpu.memory_space<vmem>>, vector<16x8xf32>
    tpu.vector_store %arg19[%c0_58, %c16], %123 {strides = array<i32>} : memref<16x32xf32, #tpu.memory_space<vmem>>, vector<16x8xf32>,
    %125 = vector.extract_strided_slice %25 {offsets = [0, 2], sizes = [16, 1], strides = [1, 1]} : vector<16x4xf32> to vector<16x1xf32>
    %cst_59 = arith.constant 1.000000e+00 : f32
    %126 = vector.broadcast %cst_59 : f32 to vector<16x1xf32>
    %127 = arith.divf %126, %125 : vector<16x1xf32>
    %cst_60 = arith.constant 0.398942292 : f32
    %128 = vector.broadcast %cst_60 : f32 to vector<16x1xf32>
    %129 = arith.mulf %128, %127 : vector<16x1xf32>
    %cst_61 = arith.constant 0.000000e+00 : f32
    %130 = vector.broadcast %cst_61 : f32 to vector<16x16xf32>
    %131 = arith.subf %130, %2 : vector<16x16xf32>
    %cst_62 = arith.constant 5.000000e-01 : f32
    %132 = vector.broadcast %cst_62 : f32 to vector<16x1xf32>
    %133 = arith.mulf %132, %127 : vector<16x1xf32>
    %134 = arith.mulf %133, %127 : vector<16x1xf32>
    %135 = vector.broadcast %134 : vector<16x1xf32> to vector<16x16xf32>
    %136 = arith.mulf %131, %135 : vector<16x16xf32>
    %137 = math.exp %136 : vector<16x16xf32>
    %138 = vector.broadcast %129 : vector<16x1xf32> to vector<16x16xf32>
    %139 = arith.mulf %138, %137 : vector<16x16xf32>
    %c0_63 = arith.constant 0 : index
    %c2 = arith.constant 2 : index
    %c0_64 = arith.constant 0 : index
    %c0_65 = arith.constant 0 : index
    %140 = vector.load %arg16[%c0_63, %c2, %c0_64, %c0_65] : memref<1x4x16x16xf32, #tpu.memory_space<vmem>>, vector<1x1x16x16xf32>
    %141 = vector.shape_cast %140 : vector<1x1x16x16xf32> to vector<16x16xf32>
    %142 = vector.shape_cast %122 : vector<16x16xf32> to vector<1x1x16x16xf32>
    tpu.vector_store %arg16[%c0_63, %c2, %c0_64, %c0_65], %142 {strides = array<i32>} : memref<1x4x16x16xf32, #tpu.memory_space<vmem>>, vector<1x1x16x16xf32>,
    %c0_66 = arith.constant 0 : index
    %c2_67 = arith.constant 2 : index
    %c0_68 = arith.constant 0 : index
    %c0_69 = arith.constant 0 : index
    %143 = vector.load %arg17[%c0_66, %c2_67, %c0_68, %c0_69] : memref<1x4x16x16xf32, #tpu.memory_space<vmem>>, vector<1x1x16x16xf32>
    %144 = vector.shape_cast %143 : vector<1x1x16x16xf32> to vector<16x16xf32>
    %145 = vector.shape_cast %139 : vector<16x16xf32> to vector<1x1x16x16xf32>
    tpu.vector_store %arg17[%c0_66, %c2_67, %c0_68, %c0_69], %145 {strides = array<i32>} : memref<1x4x16x16xf32, #tpu.memory_space<vmem>>, vector<1x1x16x16xf32>,
    %146 = vector.extract_strided_slice %8 {offsets = [0, 24], sizes = [16, 8], strides = [1, 1]} : vector<16x32xf32> to vector<16x8xf32>
    %147 = vector.extract_strided_slice %9 {offsets = [0, 24], sizes = [16, 8], strides = [1, 1]} : vector<16x32xf32> to vector<16x8xf32>
    %148 = vector.extract_strided_slice %10 {offsets = [0, 24], sizes = [16, 8], strides = [1, 1]} : vector<16x32xf32> to vector<16x8xf32>
    "tpu.trace_start"() <{level = 10 : i32, message = "qd,kd->qk"}> : () -> ()
    %cst_70 = arith.constant dense<0.000000e+00> : vector<16x16xf32>
    %149 = tpu.matmul %146, %147, %cst_70 {dimension_numbers = #tpu.dot_dimension_numbers<[1], [1], [0], [0], [0, 0, 1, 0], [], []>} : vector<16x8xf32>, vector<16x8xf32>, vector<16x16xf32> -> vector<16x16xf32>
    "tpu.trace_stop"() : () -> ()
    %cst_71 = arith.constant 0.353553385 : f32
    %150 = vector.broadcast %cst_71 : f32 to vector<16x16xf32>
    %151 = arith.mulf %149, %150 : vector<16x16xf32>
    %cst_72 = arith.constant dense<0xFF800000> : vector<16xf32>
    %152 = vector.multi_reduction <maximumf>, %151, %cst_72 [1] : vector<16x16xf32> to vector<16xf32>
    %153 = vector.shape_cast %152 : vector<16xf32> to vector<16x1xf32>
    %154 = vector.broadcast %153 : vector<16x1xf32> to vector<16x16xf32>
    %155 = arith.subf %151, %154 : vector<16x16xf32>
    %156 = math.exp %155 : vector<16x16xf32>
    %cst_73 = arith.constant dense<0.000000e+00> : vector<16xf32>
    %157 = vector.multi_reduction <add>, %156, %cst_73 [1] : vector<16x16xf32> to vector<16xf32>
    %158 = vector.shape_cast %157 : vector<16xf32> to vector<16x1xf32>
    %159 = tpu.reciprocal %158 {approx = true} : vector<16x1xf32> -> vector<16x1xf32>
    %160 = vector.broadcast %159 : vector<16x1xf32> to vector<16x16xf32>
    %161 = arith.mulf %156, %160 : vector<16x16xf32>
    %cst_74 = arith.constant dense<0.000000e+00> : vector<16x8xf32>
    %162 = tpu.matmul %161, %148, %cst_74 {dimension_numbers = #tpu.dot_dimension_numbers<[1], [0], [0], [1], [0, 0, 1, 1], [], []>} : vector<16x16xf32>, vector<16x8xf32>, vector<16x8xf32> -> vector<16x8xf32>
    %c0_75 = arith.constant 0 : index
    %c24 = arith.constant 24 : index
    %163 = vector.load %arg19[%c0_75, %c24] : memref<16x32xf32, #tpu.memory_space<vmem>>, vector<16x8xf32>
    tpu.vector_store %arg19[%c0_75, %c24], %162 {strides = array<i32>} : memref<16x32xf32, #tpu.memory_space<vmem>>, vector<16x8xf32>,
    %164 = vector.extract_strided_slice %25 {offsets = [0, 3], sizes = [16, 1], strides = [1, 1]} : vector<16x4xf32> to vector<16x1xf32>
    %cst_76 = arith.constant 1.000000e+00 : f32
    %165 = vector.broadcast %cst_76 : f32 to vector<16x1xf32>
    %166 = arith.divf %165, %164 : vector<16x1xf32>
    %cst_77 = arith.constant 0.398942292 : f32
    %167 = vector.broadcast %cst_77 : f32 to vector<16x1xf32>
    %168 = arith.mulf %167, %166 : vector<16x1xf32>
    %cst_78 = arith.constant 0.000000e+00 : f32
    %169 = vector.broadcast %cst_78 : f32 to vector<16x16xf32>
    %170 = arith.subf %169, %2 : vector<16x16xf32>
    %cst_79 = arith.constant 5.000000e-01 : f32
    %171 = vector.broadcast %cst_79 : f32 to vector<16x1xf32>
    %172 = arith.mulf %171, %166 : vector<16x1xf32>
    %173 = arith.mulf %172, %166 : vector<16x1xf32>
    %174 = vector.broadcast %173 : vector<16x1xf32> to vector<16x16xf32>
    %175 = arith.mulf %170, %174 : vector<16x16xf32>
    %176 = math.exp %175 : vector<16x16xf32>
    %177 = vector.broadcast %168 : vector<16x1xf32> to vector<16x16xf32>
    %178 = arith.mulf %177, %176 : vector<16x16xf32>
    %c0_80 = arith.constant 0 : index
    %c3 = arith.constant 3 : index
    %c0_81 = arith.constant 0 : index
    %c0_82 = arith.constant 0 : index
    %179 = vector.load %arg16[%c0_80, %c3, %c0_81, %c0_82] : memref<1x4x16x16xf32, #tpu.memory_space<vmem>>, vector<1x1x16x16xf32>
    %180 = vector.shape_cast %179 : vector<1x1x16x16xf32> to vector<16x16xf32>
    %181 = vector.shape_cast %161 : vector<16x16xf32> to vector<1x1x16x16xf32>
    tpu.vector_store %arg16[%c0_80, %c3, %c0_81, %c0_82], %181 {strides = array<i32>} : memref<1x4x16x16xf32, #tpu.memory_space<vmem>>, vector<1x1x16x16xf32>,
    %c0_83 = arith.constant 0 : index
    %c3_84 = arith.constant 3 : index
    %c0_85 = arith.constant 0 : index
    %c0_86 = arith.constant 0 : index
    %182 = vector.load %arg17[%c0_83, %c3_84, %c0_85, %c0_86] : memref<1x4x16x16xf32, #tpu.memory_space<vmem>>, vector<1x1x16x16xf32>
    %183 = vector.shape_cast %182 : vector<1x1x16x16xf32> to vector<16x16xf32>
    %184 = vector.shape_cast %178 : vector<16x16xf32> to vector<1x1x16x16xf32>
    tpu.vector_store %arg17[%c0_83, %c3_84, %c0_85, %c0_86], %184 {strides = array<i32>} : memref<1x4x16x16xf32, #tpu.memory_space<vmem>>, vector<1x1x16x16xf32>,
    %c0_87 = arith.constant 0 : index
    %c0_88 = arith.constant 0 : index
    %185 = vector.load %arg19[%c0_87, %c0_88] : memref<16x32xf32, #tpu.memory_space<vmem>>, vector<16x32xf32>
    %c0_89 = arith.constant 0 : index
    %c0_90 = arith.constant 0 : index
    %186 = vector.load %arg5[%c0_89, %c0_90] : memref<32x32xf32, #tpu.memory_space<vmem>>, vector<32x32xf32>
    %cst_91 = arith.constant dense<0.000000e+00> : vector<16x32xf32>
    %187 = tpu.matmul %185, %186, %cst_91 {dimension_numbers = #tpu.dot_dimension_numbers<[1], [0], [0], [1], [0, 0, 1, 1], [], []>} : vector<16x32xf32>, vector<32x32xf32>, vector<16x32xf32> -> vector<16x32xf32>
    %c0_92 = arith.constant 0 : index
    %c0_93 = arith.constant 0 : index
    %188 = vector.load %arg6[%c0_92, %c0_93] : memref<1x32xf32, #tpu.memory_space<vmem>>, vector<1x32xf32>
    %189 = vector.broadcast %188 : vector<1x32xf32> to vector<16x32xf32>
    %190 = arith.addf %187, %189 : vector<16x32xf32>
    %191 = arith.addf %1, %190 : vector<16x32xf32>
    %c0_94 = arith.constant 0 : index
    %c0_95 = arith.constant 0 : index
    %192 = vector.load %arg7[%c0_94, %c0_95] : memref<1x32xf32, #tpu.memory_space<vmem>>, vector<1x32xf32>
    %c0_96 = arith.constant 0 : index
    %c0_97 = arith.constant 0 : index
    %193 = vector.load %arg8[%c0_96, %c0_97] : memref<1x32xf32, #tpu.memory_space<vmem>>, vector<1x32xf32>
    %cst_98 = arith.constant dense<0.000000e+00> : vector<16xf32>
    %194 = vector.multi_reduction <add>, %191, %cst_98 [1] : vector<16x32xf32> to vector<16xf32>
    %195 = vector.shape_cast %194 : vector<16xf32> to vector<16x1xf32>
    %cst_99 = arith.constant 3.200000e+01 : f32
    %196 = vector.broadcast %cst_99 : f32 to vector<16x1xf32>
    %197 = arith.divf %195, %196 : vector<16x1xf32>
    %198 = vector.broadcast %197 : vector<16x1xf32> to vector<16x32xf32>
    %199 = arith.subf %191, %198 : vector<16x32xf32>
    %200 = vector.broadcast %197 : vector<16x1xf32> to vector<16x32xf32>
    %201 = arith.subf %191, %200 : vector<16x32xf32>
    %202 = arith.mulf %199, %201 : vector<16x32xf32>
    %cst_100 = arith.constant dense<0.000000e+00> : vector<16xf32>
    %203 = vector.multi_reduction <add>, %202, %cst_100 [1] : vector<16x32xf32> to vector<16xf32>
    %204 = vector.shape_cast %203 : vector<16xf32> to vector<16x1xf32>
    %cst_101 = arith.constant 3.200000e+01 : f32
    %205 = vector.broadcast %cst_101 : f32 to vector<16x1xf32>
    %206 = arith.divf %204, %205 : vector<16x1xf32>
    %207 = vector.broadcast %197 : vector<16x1xf32> to vector<16x32xf32>
    %208 = arith.subf %191, %207 : vector<16x32xf32>
    %cst_102 = arith.constant 9.99999974E-6 : f32
    %209 = vector.broadcast %cst_102 : f32 to vector<16x1xf32>
    %210 = arith.addf %206, %209 : vector<16x1xf32>
    %211 = math.rsqrt %210 : vector<16x1xf32>
    %212 = vector.broadcast %211 : vector<16x1xf32> to vector<16x32xf32>
    %213 = arith.mulf %208, %212 : vector<16x32xf32>
    %214 = vector.broadcast %192 : vector<1x32xf32> to vector<16x32xf32>
    %215 = arith.mulf %213, %214 : vector<16x32xf32>
    %216 = vector.broadcast %193 : vector<1x32xf32> to vector<16x32xf32>
    %217 = arith.addf %215, %216 : vector<16x32xf32>
    %c0_103 = arith.constant 0 : index
    %c0_104 = arith.constant 0 : index
    %218 = vector.load %arg9[%c0_103, %c0_104] : memref<32x128xf32, #tpu.memory_space<vmem>>, vector<32x128xf32>
    %cst_105 = arith.constant dense<0.000000e+00> : vector<16x128xf32>
    %219 = tpu.matmul %217, %218, %cst_105 {dimension_numbers = #tpu.dot_dimension_numbers<[1], [0], [0], [1], [0, 0, 1, 1], [], []>} : vector<16x32xf32>, vector<32x128xf32>, vector<16x128xf32> -> vector<16x128xf32>
    %c0_106 = arith.constant 0 : index
    %c0_107 = arith.constant 0 : index
    %220 = vector.load %arg10[%c0_106, %c0_107] : memref<1x128xf32, #tpu.memory_space<vmem>>, vector<1x128xf32>
    %221 = vector.broadcast %220 : vector<1x128xf32> to vector<16x128xf32>
    %222 = arith.addf %219, %221 : vector<16x128xf32>
    %cst_108 = arith.constant 0.000000e+00 : f32
    %223 = vector.broadcast %cst_108 : f32 to vector<16x128xf32>
    %224 = arith.maximumf %222, %223 : vector<16x128xf32>
    %c0_109 = arith.constant 0 : index
    %c0_110 = arith.constant 0 : index
    %225 = vector.load %arg11[%c0_109, %c0_110] : memref<128x32xf32, #tpu.memory_space<vmem>>, vector<128x32xf32>
    %cst_111 = arith.constant dense<0.000000e+00> : vector<16x32xf32>
    %226 = tpu.matmul %224, %225, %cst_111 {dimension_numbers = #tpu.dot_dimension_numbers<[1], [0], [0], [1], [0, 0, 1, 1], [], []>} : vector<16x128xf32>, vector<128x32xf32>, vector<16x32xf32> -> vector<16x32xf32>
    %c0_112 = arith.constant 0 : index
    %c0_113 = arith.constant 0 : index
    %227 = vector.load %arg12[%c0_112, %c0_113] : memref<1x32xf32, #tpu.memory_space<vmem>>, vector<1x32xf32>
    %228 = vector.broadcast %227 : vector<1x32xf32> to vector<16x32xf32>
    %229 = arith.addf %226, %228 : vector<16x32xf32>
    %230 = arith.addf %217, %229 : vector<16x32xf32>
    %c0_114 = arith.constant 0 : index
    %c0_115 = arith.constant 0 : index
    %231 = vector.load %arg13[%c0_114, %c0_115] : memref<1x32xf32, #tpu.memory_space<vmem>>, vector<1x32xf32>
    %c0_116 = arith.constant 0 : index
    %c0_117 = arith.constant 0 : index
    %232 = vector.load %arg14[%c0_116, %c0_117] : memref<1x32xf32, #tpu.memory_space<vmem>>, vector<1x32xf32>
    %cst_118 = arith.constant dense<0.000000e+00> : vector<16xf32>
    %233 = vector.multi_reduction <add>, %230, %cst_118 [1] : vector<16x32xf32> to vector<16xf32>
    %234 = vector.shape_cast %233 : vector<16xf32> to vector<16x1xf32>
    %cst_119 = arith.constant 3.200000e+01 : f32
    %235 = vector.broadcast %cst_119 : f32 to vector<16x1xf32>
    %236 = arith.divf %234, %235 : vector<16x1xf32>
    %237 = vector.broadcast %236 : vector<16x1xf32> to vector<16x32xf32>
    %238 = arith.subf %230, %237 : vector<16x32xf32>
    %239 = vector.broadcast %236 : vector<16x1xf32> to vector<16x32xf32>
    %240 = arith.subf %230, %239 : vector<16x32xf32>
    %241 = arith.mulf %238, %240 : vector<16x32xf32>
    %cst_120 = arith.constant dense<0.000000e+00> : vector<16xf32>
    %242 = vector.multi_reduction <add>, %241, %cst_120 [1] : vector<16x32xf32> to vector<16xf32>
    %243 = vector.shape_cast %242 : vector<16xf32> to vector<16x1xf32>
    %cst_121 = arith.constant 3.200000e+01 : f32
    %244 = vector.broadcast %cst_121 : f32 to vector<16x1xf32>
    %245 = arith.divf %243, %244 : vector<16x1xf32>
    %246 = vector.broadcast %236 : vector<16x1xf32> to vector<16x32xf32>
    %247 = arith.subf %230, %246 : vector<16x32xf32>
    %cst_122 = arith.constant 9.99999974E-6 : f32
    %248 = vector.broadcast %cst_122 : f32 to vector<16x1xf32>
    %249 = arith.addf %245, %248 : vector<16x1xf32>
    %250 = math.rsqrt %249 : vector<16x1xf32>
    %251 = vector.broadcast %250 : vector<16x1xf32> to vector<16x32xf32>
    %252 = arith.mulf %247, %251 : vector<16x32xf32>
    %253 = vector.broadcast %231 : vector<1x32xf32> to vector<16x32xf32>
    %254 = arith.mulf %252, %253 : vector<16x32xf32>
    %255 = vector.broadcast %232 : vector<1x32xf32> to vector<16x32xf32>
    %256 = arith.addf %254, %255 : vector<16x32xf32>
    %c0_123 = arith.constant 0 : index
    %c0_124 = arith.constant 0 : index
    %c0_125 = arith.constant 0 : index
    %257 = vector.load %arg15[%c0_123, %c0_124, %c0_125] : memref<1x16x32xf32, #tpu.memory_space<vmem>>, vector<1x16x32xf32>
    %258 = vector.shape_cast %257 : vector<1x16x32xf32> to vector<16x32xf32>
    %259 = vector.shape_cast %256 : vector<16x32xf32> to vector<1x16x32xf32>
    tpu.vector_store %arg15[%c0_123, %c0_124, %c0_125], %259 {strides = array<i32>} : memref<1x16x32xf32, #tpu.memory_space<vmem>>, vector<1x16x32xf32>,
    return
  }
  func.func @transform_0(%arg0: i32) -> (i32, i32, i32) {
    %c0_i32 = arith.constant 0 : i32
    %c0_i32_0 = arith.constant 0 : i32
    %c0_i32_1 = arith.constant 0 : i32
    return %arg0, %c0_i32, %c0_i32_0 : i32, i32, i32
  }
  func.func @transform_1(%arg0: i32) -> (i32, i32) {
    %c0_i32 = arith.constant 0 : i32
    %c0_i32_0 = arith.constant 0 : i32
    %c0_i32_1 = arith.constant 0 : i32
    return %c0_i32, %c0_i32_0 : i32, i32
  }
  func.func @transform_2(%arg0: i32) -> (i32, i32) {
    %c0_i32 = arith.constant 0 : i32
    %c0_i32_0 = arith.constant 0 : i32
    %c0_i32_1 = arith.constant 0 : i32
    return %c0_i32, %c0_i32_0 : i32, i32
  }
  func.func @transform_3(%arg0: i32) -> (i32, i32) {
    %c0_i32 = arith.constant 0 : i32
    %c0_i32_0 = arith.constant 0 : i32
    %c0_i32_1 = arith.constant 0 : i32
    return %c0_i32, %c0_i32_0 : i32, i32
  }
  func.func @transform_4(%arg0: i32) -> (i32, i32) {
    %c0_i32 = arith.constant 0 : i32
    %c0_i32_0 = arith.constant 0 : i32
    %c0_i32_1 = arith.constant 0 : i32
    return %c0_i32, %c0_i32_0 : i32, i32
  }
  func.func @transform_5(%arg0: i32) -> (i32, i32) {
    %c0_i32 = arith.constant 0 : i32
    %c0_i32_0 = arith.constant 0 : i32
    %c0_i32_1 = arith.constant 0 : i32
    return %c0_i32, %c0_i32_0 : i32, i32
  }
  func.func @transform_6(%arg0: i32) -> (i32, i32) {
    %c0_i32 = arith.constant 0 : i32
    %c0_i32_0 = arith.constant 0 : i32
    %c0_i32_1 = arith.constant 0 : i32
    return %c0_i32, %c0_i32_0 : i32, i32
  }
  func.func @transform_7(%arg0: i32) -> (i32, i32) {
    %c0_i32 = arith.constant 0 : i32
    %c0_i32_0 = arith.constant 0 : i32
    %c0_i32_1 = arith.constant 0 : i32
    return %c0_i32, %c0_i32_0 : i32, i32
  }
  func.func @transform_8(%arg0: i32) -> (i32, i32) {
    %c0_i32 = arith.constant 0 : i32
    %c0_i32_0 = arith.constant 0 : i32
    %c0_i32_1 = arith.constant 0 : i32
    return %c0_i32, %c0_i32_0 : i32, i32
  }
  func.func @transform_9(%arg0: i32) -> (i32, i32) {
    %c0_i32 = arith.constant 0 : i32
    %c0_i32_0 = arith.constant 0 : i32
    %c0_i32_1 = arith.constant 0 : i32
    return %c0_i32, %c0_i32_0 : i32, i32
  }
  func.func @transform_10(%arg0: i32) -> (i32, i32) {
    %c0_i32 = arith.constant 0 : i32
    %c0_i32_0 = arith.constant 0 : i32
    %c0_i32_1 = arith.constant 0 : i32
    return %c0_i32, %c0_i32_0 : i32, i32
  }
  func.func @transform_11(%arg0: i32) -> (i32, i32) {
    %c0_i32 = arith.constant 0 : i32
    %c0_i32_0 = arith.constant 0 : i32
    %c0_i32_1 = arith.constant 0 : i32
    return %c0_i32, %c0_i32_0 : i32, i32
  }
  func.func @transform_12(%arg0: i32) -> (i32, i32) {
    %c0_i32 = arith.constant 0 : i32
    %c0_i32_0 = arith.constant 0 : i32
    %c0_i32_1 = arith.constant 0 : i32
    return %c0_i32, %c0_i32_0 : i32, i32
  }
  func.func @transform_13(%arg0: i32) -> (i32, i32) {
    %c0_i32 = arith.constant 0 : i32
    %c0_i32_0 = arith.constant 0 : i32
    %c0_i32_1 = arith.constant 0 : i32
    return %c0_i32, %c0_i32_0 : i32, i32
  }
  func.func @transform_14(%arg0: i32) -> (i32, i32, i32) {
    %c0_i32 = arith.constant 0 : i32
    %c0_i32_0 = arith.constant 0 : i32
    %c0_i32_1 = arith.constant 0 : i32
    return %arg0, %c0_i32, %c0_i32_0 : i32, i32, i32
  }
  func.func @transform_15(%arg0: i32) -> (i32, i32, i32, i32) {
    %c0_i32 = arith.constant 0 : i32
    %c0_i32_0 = arith.constant 0 : i32
    %c0_i32_1 = arith.constant 0 : i32
    %c0_i32_2 = arith.constant 0 : i32
    return %arg0, %c0_i32, %c0_i32_0, %c0_i32_1 : i32, i32, i32, i32
  }
  func.func @transform_16(%arg0: i32) -> (i32, i32, i32, i32) {
    %c0_i32 = arith.constant 0 : i32
    %c0_i32_0 = arith.constant 0 : i32
    %c0_i32_1 = arith.constant 0 : i32
    %c0_i32_2 = arith.constant 0 : i32
    return %arg0, %c0_i32, %c0_i32_0, %c0_i32_1 : i32, i32, i32, i32
  }
  func.func @transform_17(%arg0: i32) -> (i32, i32, i32) {
    %c0_i32 = arith.constant 0 : i32
    %c0_i32_0 = arith.constant 0 : i32
    %c0_i32_1 = arith.constant 0 : i32
    return %arg0, %c0_i32, %c0_i32_0 : i32, i32, i32
  }
}

</mosaic_0001>

<bundles_post_ra>
// kernel: encoder_layer_forward.1
= control target key start
LH: loop header
LB: loop body
LE: loop exit
PB: predicated region body
PF: predicated region fallthrough
CT: control target
= control target key end

     0   :  { %s2755_s0 = inlined_call_operand.vmem [shape: f32[2,16,32], index: 0, kind: input, shape index: {}]   ;;  %s2756_s1 = inlined_call_operand.vmem [shape: f32[16,16], index: 1, kind: input, shape index: {}]   ;;  %s2757_s2 = inlined_call_operand.vmem [shape: f32[32,100], index: 2, kind: input, shape index: {}]   ;;  %s2758_s3 = inlined_call_operand.vmem [shape: f32[1,100], index: 3, kind: input, shape index: {}]   ;;  %s2759_s4 = inlined_call_operand.vmem [shape: f32[32,32], index: 4, kind: input, shape index: {}]   ;;  %s2760_s5 = inlined_call_operand.vmem [shape: f32[1,32], index: 5, kind: input, shape index: {}]   ;;  %s2761_s6 = inlined_call_operand.vmem [shape: f32[1,32], index: 6, kind: input, shape index: {}]   ;;  %s2762_s7 = inlined_call_operand.vmem [shape: f32[1,32], index: 7, kind: input, shape index: {}]   ;;  %s2763_s8 = inlined_call_operand.vmem [shape: f32[32,128], index: 8, kind: input, shape index: {}]   ;;  %s2764_s9 = inlined_call_operand.vmem [shape: f32[1,128], index: 9, kind: input, shape index: {}]   ;;  %s2765_s10 = inlined_call_operand.vmem [shape: f32[128,32], index: 10, kind: input, shape index: {}]   ;;  %s2766_s11 = inlined_call_operand.vmem [shape: f32[1,32], index: 11, kind: input, shape index: {}]   ;;  %s2767_s12 = inlined_call_operand.vmem [shape: f32[1,32], index: 12, kind: input, shape index: {}]   ;;  %s2768_s13 = inlined_call_operand.vmem [shape: f32[1,32], index: 13, kind: input, shape index: {}]   ;;  %s2769_s14 = inlined_call_operand.hbm [shape: f32[2,16,32], index: 14, kind: output, shape index: {0}]   ;;  %s2770_s15 = inlined_call_operand.hbm [shape: f32[2,4,16,16], index: 15, kind: output, shape index: {1}]   ;;  %s2771_s16 = inlined_call_operand.hbm [shape: f32[2,4,16,16], index: 16, kind: output, shape index: {2}]   ;;  %s2772_s17 = inlined_call_operand.vmem [shape: f32[2,16,4], index: 17, kind: output, shape index: {3}]  }
   0x1   :  { %2788 = sst [smem:[#allocation15_spill]] %s2755_s0 }
   0x2   :  { %2789 = sst [smem:[#allocation16_spill]] %s2756_s1 }
   0x3   :  { %2790 = sst [smem:[#allocation17_spill]] %s2757_s2 }
   0x4   :  { %2791 = sst [smem:[#allocation18_spill]] %s2758_s3 }
   0x5   :  { %2792 = sst [smem:[#allocation19_spill]] %s2759_s4 }
   0x6   :  { %2793 = sst [smem:[#allocation20_spill]] %s2760_s5 }
   0x7   :  { %2794 = sst [smem:[#allocation21_spill]] %s2761_s6 }
   0x8   :  { %23 = vsyncpa [#allocation4], 0 }
   0x9   :  { %25 = vsyncpa [#allocation4 + $0x1], 0 }
   0xa   :  { %26 = vsyncpa [#allocation6], 0 }
   0xb   :  { %28 = vsyncpa [#allocation6 + $0x1], 0  ;;  %s2226_s24 = smov 0   ;;  %s2228_s25 = smov 0  }
   0xc   :  { %s2230_s26 = smov 0   ;;  %s2232_s27 = smov 0  }
   0xd LB: > { %2795 = sst [smem:[#allocation10_spill]] %s2105_s25  ;;  %s2247_s28 = sadd.s32 4294967295, %s2113_s27   ;;  %s2113_s27 = sphi %s2232_s27, %s2817_s27   ;;  %s2109_s26 = sphi %s2230_s26, %s2820_s26   ;;  %s2105_s25 = sphi %s2228_s25, %s2819_s25   ;;  %s2101_s24 = sphi %s2226_s24, %s2818_s24  }
   0xe   : > { %2796 = sst [smem:[#allocation11_spill]] %s2109_s26  ;;  %s2774_s29 = sadd.s32 4294967294, %s2113_s27  }
   0xf   : > { %s2251_s0 = sadd.s32 1, %s2113_s27   ;;  %s340_s30 = sadd.s32 1, %s2109_s26 }
  0x10   : > { %2797 = sst [smem:[#allocation12_spill]] %s2251_s0  ;;  %s337_s18 = ssub.s32 %s2113_s27, %s2251_s0 }
  0x11   : > { %p350_p0 = scmp.ne.s32.totalorder %s2109_s26, %s2105_s25  ;;  %p338_p1 = scmp.eq.s32.totalorder %s337_s18, 0 }
  0x12   : > { %p351_p2 = scmp.eq.s32.totalorder %s2247_s28, 1  ;;  %p356_p3 = scmp.ne.s32.totalorder %s2105_s25, %s2101_s24 }
  0x13   : > { %p357_p4 = scmp.eq.s32.totalorder %s2774_s29, 1  ;;  %p1732_p7 = scmp.ge.s32.totalorder %s2113_s27, 1 }
  0x14   : > { %s2264_s19 = scalar_select %p338_p1, %s2109_s26, %s340_s30  }
  0x15   : > { %p2266_p5 = por %p351_p2, %p350_p0  ;;  %p2270_p6 = por %p357_p4, %p356_p3 }
  0x16   : > { %2798 = sst [smem:[#allocation13_spill]] %s2264_s19  ;;  %p500_p8 = scmp.lt.s32.totalorder %s2113_s27, 3 }
  0x17   : > { %s2800_s20 = scalar_select %p2270_p6, 1, 0 }
  0x18   : > { %p501_p9 = pnand %p1732_p7, %p500_p8 }
  0x19   : > { %2801 = sst [smem:[#allocation14_spill]] %s2800_s20  ;;  %p567_p10 = scmp.lt.s32.totalorder (!%p501_p9), %s2247_s28, 1 }
  0x1a   : > { %504 = sbr.rel (%p501_p9) target bundleno = 2318 (0x90e), region = 76  ;;  %s2802_s2 = sld [smem:[#allocation17_spill]] (!%p501_p9) }
  0x1b   : > { %s2803_s0 = sld [smem:[#allocation15_spill]] (!%p501_p9)  ;;  %s2117_s18 = smov (!%p501_p9), 88  }
  0x1c   : > { %s2804_s3 = sld [smem:[#allocation18_spill]] (!%p501_p9)  ;;  %s2118_s21 = smov (!%p501_p9), 120  }
  0x1d   : > { %s2119_s23 = smov (!%p501_p9), 72   ;;  %s2120_s30 = smov (!%p501_p9), 80  }
  0x1e   : > { %s2121_s26 = smov (!%p501_p9), 112   ;;  %s2122_s29 = smov (!%p501_p9), 104  }
  0x1f   : > { %s2287_s19 = scalar_select %p567_p10, %s2247_s28, 1  ;;  %vm589_vm0 = vcmask 261120   ;;  %vm684_vm1 = vcmask 64512   ;;  %vm718_vm2 = vcmask 130048   ;;  %vm954_vm3 = vcmask 130112  }
  0x20   : > { %v584_v0 = vld [vmem:[%s2802_s2 + $0x18] sm:$0xff]  ;;  %v583_v1 = vld [vmem:[%s2802_s2 + $0x10] sm:$0xff]  ;;  %v582_v2 = vld [vmem:[%s2802_s2 + $0x8] sm:$0xff]  ;;  %s2805_s4 = sld [smem:[#allocation19_spill]]  ;;  %vm1093_vm4 = vcmask 195712   ;;  %vm1232_vm5 = vcmask 261312  }
  0x21   : > { %608 = vmatpush.msra.mxu0 %v584_v0  ;;  %v581_v3 = vld [vmem:[%s2802_s2] sm:$0xff]  ;;  %s2780_s22 = sshll.u32 %s2287_s19, 4  ;;  %s2806_s5 = sld [smem:[#allocation20_spill]] }
  0x22   : > { %s571_s20 = scalar_lea.vmem %s2803_s0, %s2780_s22  ;;  %v1909_v7 = vld [vmem:[%s2804_s3] ss:$0 sm:$0xff]  ;;  %s2115_s0 = smov 96  }
  0x23   : > { %609 = vmatpush.msra.mxu0 %v583_v1  ;;  %v2298_v4 = vld [vmem:[%s571_s20] sm:$0xff]  ;;  %v2302_v5 = vld [vmem:[%s571_s20 + $0x8] sm:$0xff]  ;;  %s2116_s20 = smov 64   ;;  %s2807_s3 = sshll.u32 %s2287_s19, 4 }
  0x24   : > { %s2808_s6 = sld [smem:[#allocation21_spill]] }
  0x25   : > { %610 = vmatpush.msra.mxu0 %v582_v2 }
  0x27   : > { %611 = vmatpush.msra.mxu0 %v581_v3 }
  0x28   : > { %1740 = vmatmul.msk.f32.vlgmr.msra.gmra.mxu0 %vm589_vm0, %v2298_v4 }
  0x30   : > { %1741 = vmatmul.msk.f32.gmra.mxu0 %vm589_vm0, %v2302_v5 }
  0xa5   : > { %v613_v6 = vpop.f32.mrf.mxu0 }
  0xa6   : > { %v2309_v9 = vadd.f32 %v1909_v7, %v613_v6 }
  0xad   : > { %v616_v8 = vpop.f32.mrf.mxu0 }
  0xae   : > { %v2311_v10 = vadd.f32 %v1909_v7, %v616_v8 }
  0xb0   : > { %682 = vrot.lane.b32.xlu0 %v2311_v10, %s2115_s0  ;;  %v2316_v11 = vpack.i.bf16 %v2309_v9, %v2311_v10 }
  0xb2   : > { %1873 = vrot.lane.b32.xlu2 %v2316_v11, %s2116_s20 }
  0xb8   : > { %680 = vrot.lane.b32.xlu0 %v2309_v9, %s2115_s0  ;;  %s2351_s0 = sand.u32 1, %s2105_s25   ;;  %s2132_s25 = smov 32  }
  0xb9   : > { %s2779_s20 = sshll.u32 %s2351_s0, 6 }
  0xba   : > { %852 = vrot.lane.b32.xlu2 %v2309_v9, %s2117_s18 }
  0xc2   : > { %848 = vrot.lane.b32.xlu2 %v2309_v9, %s2118_s21 }
 0x10c   : > { %v1874_v12 = vpop.permute.xlu2 %1873 }
 0x10d   : > { %v1875_v13 = vunpack.i.l.bf16 %v1874_v12  ;;  %v1876_v14 = vunpack.i.h.bf16 %v1874_v12 }
 0x10f   : > { %767 = vmatpush.msra.mxu2 %v1875_v13 }
 0x111   : > { %768 = vmatpush.msra.mxu2 %v1876_v14 }
 0x114   : > { %v853_v34 = vpop.permute.xlu2 %852 }
 0x11c   : > { %v849_v38 = vpop.permute.xlu2 %848 }
 0x122   : > { %v683_v15 = vpop.permute.xlu0 %682 }
 0x123   : > { %1744 = vmatpush.xpose.msk.msra.mxu1 %vm684_vm1, %v683_v15 }
 0x12a   : > { %v681_v16 = vpop.permute.xlu0 %680 }
 0x12b   : > { %1745 = vmatpush.xpose.msk.msra.mxu1 %vm684_vm1, %v681_v16 }
 0x12e   : > { %1746 = vmatmul.msk.f32.vlgmr.msra.gmra.mxu1 %vm684_vm1, %v2309_v9 }
 0x136   : > { %1747 = vmatmul.msk.f32.gmra.mxu1 %vm684_vm1, %v2311_v10 }
 0x1ab   : > { %v710_v17 = vpop.f32.mrf.mxu1 }
 0x1ac   : > { %v716_v18 = vmul.f32 0.35355338, %v710_v17 }
 0x1ae   : > { %v719_v19 = vsel %vm718_vm2, %v716_v18, -inf }
 0x1af   : > { %720 = vmax.xlane.f32.xlu1 %v719_v19 }
 0x1b3   : > { %v713_v20 = vpop.f32.mrf.mxu1 }
 0x1b4   : > { %v717_v21 = vmul.f32 0.35355338, %v713_v20 }
 0x1b6   : > { %v722_v22 = vsel %vm718_vm2, %v717_v21, -inf }
 0x1b7   : > { %723 = vmax.xlane.f32.xlu1 %v722_v22 }
 0x1d0   : > { %854 = vrot.lane.b32.xlu1 %v2311_v10, %s2117_s18  ;;  %s2358_s18 = scalar_lea.vmem [#allocation5], %s2779_s20 }
 0x1d1   : > { %s1556_s2 = sshll.u32 %s2358_s18, 4  ;;  %s1557_s2 = int_to_ptr.vmem [resolvable:$true] %s1556_s2 }
 0x1d8   : > { %850 = vrot.lane.b32.xlu1 %v2311_v10, %s2118_s21  ;;  %s2123_s21 = smov 56  }
 0x1e0   : > { %1130 = vrot.lane.b32.xlu1 %v2309_v9, %s2119_s23 }
 0x1e8   : > { %993 = vrot.lane.b32.xlu1 %v2311_v10, %s2120_s30 }
 0x1f0   : > { %987 = vrot.lane.b32.xlu1 %v2309_v9, %s2121_s26 }
 0x222   : > { %v721_v23 = vpop.xlane.xlu1 %720 }
 0x223   : > { %v725_v24 = vsub.f32 %v716_v18, %v721_v23 }
 0x225   : > { %v727_v25 = vmul.f32 1.442695, %v725_v24 }
 0x227   : > { %1917 = vpow2.f32 %v727_v25 }
 0x22a   : > { %v724_v26 = vpop.xlane.xlu1 %723 }
 0x22b   : > { %v726_v27 = vsub.f32 %v717_v21, %v724_v26 }
 0x22d   : > { %v1918_v28 = vpop.eup %1917  ;;  %v729_v29 = vmul.f32 1.442695, %v726_v27 }
 0x22e   : > { %v731_v30 = vsel %vm718_vm2, %v1918_v28, 0.0 }
 0x22f   : > { %1919 = vpow2.f32 %v729_v29  ;;  %732 = vadd.xlane.f32.xlu2 %v731_v30 }
 0x235   : > { %v1920_v31 = vpop.eup %1919 }
 0x236   : > { %v734_v32 = vsel %vm718_vm2, %v1920_v31, 0.0 }
 0x237   : > { %735 = vadd.xlane.f32.xlu0 %v734_v32 }
 0x242   : > { %v855_v33 = vpop.permute.xlu1 %854 }
 0x243   : > { %1750 = vmatpush.xpose.msk.msrb.mxu2 %vm684_vm1, %v855_v33  ;;  %1800 = vmatpush.xpose.msk.msra.mxu3 %vm684_vm1, %v855_v33 }
 0x247   : > { %1132 = vrot.lane.b32.xlu2 %v2311_v10, %s2119_s23  ;;  %1751 = vmatpush.xpose.msk.msrb.mxu2 %vm684_vm1, %v853_v34  ;;  %s2124_s23 = smov 48  }
 0x248   : > { %1801 = vmatpush.xpose.msk.msra.mxu3 %vm684_vm1, %v853_v34 }
 0x24a   : > { %v851_v35 = vpop.permute.xlu1 %850 }
 0x24b   : > { %991 = vrot.lane.b32.xlu0 %v2309_v9, %s2120_s30  ;;  %1753 = vmatmul.msk.f32.vlgmr.msra.gmra.mxu3 %vm684_vm1, %v851_v35  ;;  %s2125_s30 = smov 40  }
 0x24f   : > { %1126 = vrot.lane.b32.xlu2 %v2309_v9, %s2122_s29 }
 0x252   : > { %v1131_v36 = vpop.permute.xlu1 %1130 }
 0x257   : > { %1128 = vrot.lane.b32.xlu2 %v2311_v10, %s2122_s29  ;;  %s2127_s29 = smov 16  }
 0x25a   : > { %v994_v37 = vpop.permute.xlu1 %993 }
 0x25b   : > { %1760 = vmatpush.xpose.msk.msrb.mxu0 %vm684_vm1, %v994_v37 }
 0x25f   : > { %989 = vrot.lane.b32.xlu2 %v2311_v10, %s2121_s26  ;;  %s2781_s26 = smov 8  }
 0x262   : > { %v988_v49 = vpop.permute.xlu1 %987 }
 0x2a2   : > { %v733_v39 = vpop.xlane.xlu2 %732 }
 0x2a3   : > { %1921 = vrcp.f32 %v733_v39 }
 0x2a9   : > { %v1922_v40 = vpop.eup %1921 }
 0x2aa   : > { %v1133_v41 = vpop.permute.xlu2 %1132  ;;  %v736_v42 = vpop.xlane.xlu0 %735  ;;  %v739_v43 = vmul.f32 %v1922_v40, %v1918_v28 }
 0x2ab   : > { %1923 = vrcp.f32 %v736_v42  ;;  %1770 = vmatpush.xpose.msk.msrb.mxu3 %vm684_vm1, %v1133_v41 }
 0x2ac   : > { %1748 = vmatmul.msk.f32.vlgmr.msra.gmra.mxu2 %vm718_vm2, %v739_v43  ;;  %844 = vst.msk [vmem:[%s2358_s18] sm:$0xff] %vm718_vm2, %v739_v43 }
 0x2af   : > { %1771 = vmatpush.xpose.msk.msrb.mxu3 %vm684_vm1, %v1131_v36 }
 0x2b1   : > { %v1924_v44 = vpop.eup %1923 }
 0x2b2   : > { %v1127_v45 = vpop.permute.xlu2 %1126  ;;  %v740_v46 = vmul.f32 %v1924_v44, %v1920_v31 }
 0x2b3   : > { %1772 = vmatmul.msk.f32.vlgmr.msrb.gmra.mxu3 %vm684_vm1, %v1127_v45 }
 0x2b4   : > { %1749 = vmatmul.msk.f32.gmra.mxu2 %vm718_vm2, %v740_v46  ;;  %845 = vst.msk [vmem:[%s2358_s18 + $0x8] sm:$0xff] %vm718_vm2, %v740_v46 }
 0x2ba   : > { %v1129_v47 = vpop.permute.xlu2 %1128 }
 0x2bb   : > { %1773 = vmatmul.msk.f32.gmra.mxu3 %vm684_vm1, %v1129_v47 }
 0x2bc   : > { %1752 = vmatmul.msk.f32.vlgmr.msrb.gmra.mxu2 %vm684_vm1, %v849_v38 }
 0x2bd   : > { %v992_v48 = vpop.permute.xlu0 %991 }
 0x2be   : > { %1761 = vmatpush.xpose.msk.msrb.mxu0 %vm684_vm1, %v992_v48 }
 0x2c1   : > { %1762 = vmatmul.msk.f32.vlgmr.msrb.gmra.mxu0 %vm684_vm1, %v988_v49 }
 0x2c2   : > { %v990_v50 = vpop.permute.xlu2 %989 }
 0x2c9   : > { %1763 = vmatmul.msk.f32.gmra.mxu0 %vm684_vm1, %v990_v50 }
 0x2ce   : > { %v884_v51 = vpop.f32.mrf.mxu3 }
 0x2cf   : > { %v888_v52 = vmul.f32 0.35355338, %v884_v51 }
 0x2d1   : > { %v892_v53 = vsel %vm718_vm2, %v888_v52, -inf }
 0x2d2   : > { %893 = vmax.xlane.f32.xlu0 %v892_v53 }
 0x32f   : > { %v770_v54 = vpop.f32.mrf.mxu2 }
 0x330   : > { %776 = vst.msk [vmem:[#allocation2] sm:$0xff] %vm684_vm1, %v770_v54 }
 0x336   : > { %v1159_v55 = vpop.f32.mrf.mxu3 }
 0x337   : > { %v1165_v56 = vmul.f32 0.35355338, %v1159_v55  ;;  %v773_v57 = vpop.f32.mrf.mxu2 }
 0x338   : > { %777 = vst.msk [vmem:[#allocation2 + $0x8] sm:$0xff] %vm684_vm1, %v773_v57 }
 0x339   : > { %v1167_v58 = vsel %vm718_vm2, %v1165_v56, -inf }
 0x33a   : > { %1168 = vmax.xlane.f32.xlu2 %v1167_v58 }
 0x33e   : > { %v1020_v59 = vpop.f32.mrf.mxu0  ;;  %v1162_v60 = vpop.f32.mrf.mxu3 }
 0x33f   : > { %v1166_v61 = vmul.f32 0.35355338, %v1162_v60  ;;  %v881_v62 = vpop.f32.mrf.mxu2  ;;  %v1026_v3 = vmul.f32 0.35355338, %v1020_v59 }
 0x340   : > { %v887_v63 = vmul.f32 0.35355338, %v881_v62 }
 0x341   : > { %v1170_v0 = vsel %vm718_vm2, %v1166_v61, -inf  ;;  %v1028_v14 = vsel %vm718_vm2, %v1026_v3, -inf }
 0x342   : > { %1171 = vmax.xlane.f32.xlu0 %v1170_v0  ;;  %v889_v1 = vsel %vm718_vm2, %v887_v63, -inf }
 0x343   : > { %890 = vmax.xlane.f32.xlu1 %v889_v1 }
 0x345   : > { %v894_v2 = vpop.xlane.xlu0 %893 }
 0x346   : > { %v896_v6 = vsub.f32 %v888_v52, %v894_v2  ;;  %v1023_v7 = vpop.f32.mrf.mxu0 }
 0x347   : > { %v1027_v8 = vmul.f32 0.35355338, %v1023_v7 }
 0x348   : > { %v899_v12 = vmul.f32 1.442695, %v896_v6 }
 0x349   : > { %v1031_v13 = vsel %vm718_vm2, %v1027_v8, -inf }
 0x34a   : > { %1925 = vpow2.f32 %v899_v12  ;;  %1032 = vmax.xlane.f32.xlu2 %v1031_v13 }
 0x34b   : > { %1029 = vmax.xlane.f32.xlu1 %v1028_v14 }
 0x350   : > { %v1926_v15 = vpop.eup %1925 }
 0x351   : > { %v904_v16 = vsel %vm718_vm2, %v1926_v15, 0.0 }
 0x352   : > { %905 = vadd.xlane.f32.xlu2 %v904_v16  ;;  %v1269_v16 = vld [vmem:[%s2805_s4 + $0x10] sm:$0xff] }
 0x356   : > { %1878 = vrot.lane.b32.xlu0 %v2316_v11, %s2123_s21  ;;  %s2128_s21 = smov 24  }
 0x35e   : > { %1888 = vrot.lane.b32.xlu0 %v2316_v11, %s2124_s23 }
 0x3ad   : > { %v1169_v17 = vpop.xlane.xlu2 %1168 }
 0x3ae   : > { %v1173_v18 = vsub.f32 %v1165_v56, %v1169_v17  ;;  %v1268_v17 = vld [vmem:[%s2805_s4 + $0x8] sm:$0xff] }
 0x3b0   : > { %v1175_v19 = vmul.f32 1.442695, %v1173_v18  ;;  %v1267_v18 = vld [vmem:[%s2805_s4] sm:$0xff] }
 0x3b2   : > { %1927 = vpow2.f32 %v1175_v19 }
 0x3b5   : > { %v1172_v26 = vpop.xlane.xlu0 %1171 }
 0x3b6   : > { %v891_v20 = vpop.xlane.xlu1 %890  ;;  %v1174_v30 = vsub.f32 %v1166_v61, %v1172_v26 }
 0x3b7   : > { %v895_v21 = vsub.f32 %v887_v63, %v891_v20 }
 0x3b8   : > { %v1928_v22 = vpop.eup %1927  ;;  %v1177_v33 = vmul.f32 1.442695, %v1174_v30 }
 0x3b9   : > { %v897_v23 = vmul.f32 1.442695, %v895_v21  ;;  %v1179_v24 = vsel %vm718_vm2, %v1928_v22, 0.0 }
 0x3ba   : > { %1180 = vadd.xlane.f32.xlu1 %v1179_v24 }
 0x3bb   : > { %1929 = vpow2.f32 %v897_v23 }
 0x3bd   : > { %v1033_v25 = vpop.xlane.xlu2 %1032 }
 0x3be   : > { %v1030_v27 = vpop.xlane.xlu1 %1029  ;;  %v1035_v37 = vsub.f32 %v1027_v8, %v1033_v25 }
 0x3bf   : > { %v1034_v28 = vsub.f32 %v1026_v3, %v1030_v27  ;;  %v620_v27 = vmul.f32 -5.0, %v2311_v10 }
 0x3c0   : > { %v1038_v42 = vmul.f32 1.442695, %v1035_v37 }
 0x3c1   : > { %v1930_v29 = vpop.eup %1929  ;;  %v1036_v31 = vmul.f32 1.442695, %v1034_v28  ;;  %v623_v28 = vmul.f32 1.442695, %v620_v27 }
 0x3c2   : > { %v901_v32 = vsel %vm718_vm2, %v1930_v29, 0.0 }
 0x3c3   : > { %1931 = vpow2.f32 %v1036_v31  ;;  %902 = vadd.xlane.f32.xlu1 %v901_v32 }
 0x3c5   : > { %v906_v34 = vpop.xlane.xlu2 %905 }
 0x3c6   : > { %1933 = vrcp.f32 %v906_v34 }
 0x3c7   : > { %1935 = vpow2.f32 %v1177_v33 }
 0x3c8   : > { %v1879_v35 = vpop.permute.xlu0 %1878  ;;  %1937 = vpow2.f32 %v1038_v42  ;;  %v2129_v42 = vmov 96  }
 0x3c9   : > { %v1932_v36 = vpop.eup %1931  ;;  %v1880_v38 = vunpack.i.l.bf16 %v1879_v35  ;;  %v1881_v40 = vunpack.i.h.bf16 %v1879_v35  ;;  %1893 = vset.pattern.permute.xlu1 %v2129_v42  ;;  %1892 = vset.pattern.permute.xlu0 %v2129_v42 }
 0x3ca   : > { %v1040_v39 = vsel %vm718_vm2, %v1932_v36, 0.0 }
 0x3cb   : > { %937 = vmatpush.msra.mxu2 %v1880_v38  ;;  %1041 = vadd.xlane.f32.xlu2 %v1040_v39 }
 0x3cc   : > { %v1934_v41 = vpop.eup %1933 }
 0x3cd   : > { %938 = vmatpush.msra.mxu2 %v1881_v40  ;;  %v910_v43 = vmul.f32 %v1934_v41, %v1926_v15  ;;  %v1936_v44 = vpop.eup %1935  ;;  %v1270_v15 = vld [vmem:[%s2805_s4 + $0x18] sm:$0xff] }
 0x3ce   : > { %v1182_v47 = vsel %vm718_vm2, %v1936_v44, 0.0  ;;  %v1938_v49 = vpop.eup %1937  ;;  %1293 = vmatpush.msra.mxu0 %v1270_v15 }
 0x3cf   : > { %1757 = vst.msk [vmem:[%s2358_s18 + $0x18] sm:$0xff] %vm718_vm2, %v910_v43  ;;  %v1043_v50 = vsel %vm718_vm2, %v1938_v49, 0.0 }
 0x3d0   : > { %v1889_v45 = vpop.permute.xlu0 %1888  ;;  %1294 = vmatpush.msra.mxu0 %v1269_v16 }
 0x3d1   : > { %v1890_v46 = vunpack.i.l.bf16 %v1889_v45  ;;  %v1891_v48 = vunpack.i.h.bf16 %v1889_v45  ;;  %v1910_v45 = vld [vmem:[%s2806_s5] ss:$0 sm:$0xff] }
 0x3d2   : > { %1295 = vmatpush.msra.mxu0 %v1268_v17 }
 0x3d3   : > { %1076 = vmatpush.msrb.mxu1 %v1890_v46  ;;  %1183 = vadd.xlane.f32.xlu2 %v1182_v47 }
 0x3d4   : > { %1296 = vmatpush.msra.mxu0 %v1267_v18 }
 0x3d5   : > { %1077 = vmatpush.msrb.mxu1 %v1891_v48 }
 0x3db   : > { %1044 = vadd.xlane.f32.xlu2 %v1043_v50 }
 0x3dc   : > { %1883 = vrot.lane.b32.xlu1 %v2316_v11, %s2125_s30 }
 0x42d   : > { %v1181_v51 = vpop.xlane.xlu1 %1180 }
 0x42e   : > { %1939 = vrcp.f32 %v1181_v51 }
 0x434   : > { %v1940_v52 = vpop.eup %1939 }
 0x435   : > { %v1187_v53 = vmul.f32 %v1940_v52, %v1928_v22 }
 0x436   : > { %v903_v54 = vpop.xlane.xlu1 %902 }
 0x437   : > { %1776 = vst.msk [vmem:[%s2358_s18 + $0x30] sm:$0xff] %vm718_vm2, %v1187_v53  ;;  %1941 = vrcp.f32 %v903_v54 }
 0x43d   : > { %v1942_v55 = vpop.eup %1941 }
 0x43e   : > { %v909_v56 = vmul.f32 %v1942_v55, %v1930_v29  ;;  %v1042_v57 = vpop.xlane.xlu2 %1041 }
 0x43f   : > { %1943 = vrcp.f32 %v1042_v57 }
 0x440   : > { %1756 = vst.msk [vmem:[%s2358_s18 + $0x10] sm:$0xff] %vm718_vm2, %v909_v56  ;;  %1754 = vmatmul.msk.f32.vlgmr.msra.gmra.mxu2 %vm718_vm2, %v909_v56 }
 0x445   : > { %v1944_v58 = vpop.eup %1943 }
 0x446   : > { %v1184_v11 = vpop.xlane.xlu2 %1183  ;;  %v1048_v59 = vmul.f32 %v1944_v58, %v1932_v36 }
 0x447   : > { %1945 = vrcp.f32 %v1184_v11 }
 0x448   : > { %1755 = vmatmul.msk.f32.gmra.mxu2 %vm718_vm2, %v910_v43  ;;  %1764 = vmatmul.msk.f32.vlgmr.msrb.gmra.mxu1 %vm718_vm2, %v1048_v59  ;;  %1766 = vst.msk [vmem:[%s2358_s18 + $0x20] sm:$0xff] %vm718_vm2, %v1048_v59 }
 0x44d   : > { %v1946_v60 = vpop.eup %1945 }
 0x44e   : > { %v1045_v61 = vpop.xlane.xlu2 %1044  ;;  %v1884_v62 = vpop.permute.xlu1 %1883  ;;  %v1188_v63 = vmul.f32 %v1946_v60, %v1936_v44 }
 0x44f   : > { %1947 = vrcp.f32 %v1045_v61  ;;  %v1885_v0 = vunpack.i.l.bf16 %v1884_v62  ;;  %v1886_v1 = vunpack.i.h.bf16 %v1884_v62 }
 0x450   : > { %1777 = vst.msk [vmem:[%s2358_s18 + $0x38] sm:$0xff] %vm718_vm2, %v1188_v63  ;;  %1949 = vpow2.f32 %v623_v28 }
 0x451   : > { %1215 = vmatpush.msrb.mxu2 %v1885_v0 }
 0x453   : > { %1216 = vmatpush.msrb.mxu2 %v1886_v1  ;;  %v619_v1 = vmul.f32 -5.0, %v2309_v9 }
 0x454   : > { %1774 = vmatmul.msk.f32.vlgmr.msrb.gmra.mxu2 %vm718_vm2, %v1187_v53  ;;  %v2130_v53 = vmov 97  }
 0x455   : > { %v1948_v2 = vpop.eup %1947  ;;  %1894 = vset.pattern.permute.xlu2 %v2130_v53 }
 0x456   : > { %v1049_v3 = vmul.f32 %v1948_v2, %v1938_v49  ;;  %v1950_v29 = vpop.eup %1949  ;;  %v621_v2 = vmul.f32 1.442695, %v619_v1  ;;  %v1423_v1 = vld [vmem:[%s2765_s10 + $0x78] sm:$0xff] }
 0x457   : > { %v626_v30 = vadd.f32 1.0, %v1950_v29  ;;  %1428 = vmatpush.msra.mxu3 %v1423_v1 }
 0x458   : > { %1765 = vmatmul.msk.f32.gmra.mxu1 %vm718_vm2, %v1049_v3  ;;  %1767 = vst.msk [vmem:[%s2358_s18 + $0x28] sm:$0xff] %vm718_vm2, %v1049_v3  ;;  %s2011_s18 = scalar_lea.hbm %s2770_s15, 128 }
 0x459   : > { %1951 = vrcp.f32 %v626_v30  ;;  %v653_v36 = vand.u32 2147483648, %v626_v30  ;;  %vm647_vm7 = vweird.f32 %v626_v30  ;;  %v651_v37 = vand.u32 2147483647, %v626_v30 }
 0x45b   : > { %v654_v39 = vor.u32 1.1754944e-38, %v653_v36  ;;  %vm652_vm9 = vcmp.eq.f32.partialorder %v651_v37, 8.507059e+37 }
 0x45c   : > { %1775 = vmatmul.msk.f32.gmra.mxu2 %vm718_vm2, %v1188_v63 }
 0x45f   : > { %v1952_v31 = vpop.eup %1951 }
 0x460   : > { %v643_v32 = vmul.f32 %v1952_v31, %v626_v30  ;;  %vm648_vm6 = vweird.f32 %v1952_v31 }
 0x461   : > { %vm649_vm8 = vmor %vm647_vm7, %vm648_vm6 }
 0x462   : > { %v644_v33 = vsub.f32 1.0, %v643_v32 }
 0x464   : > { %v645_v34 = vmul.f32 %v1952_v31, %v644_v33 }
 0x466   : > { %v646_v35 = vadd.f32 %v1952_v31, %v645_v34 }
 0x468   : > { %v650_v38 = vsel %vm649_vm8, %v1952_v31, %v646_v35 }
 0x469   : > { %v655_v40 = vsel %vm652_vm9, %v654_v39, %v650_v38  ;;  %vm675_vm9 = vcmask 31744  }
 0x46a   : > { %v658_v10 = vadd.f32 1e-05, %v655_v40 }
 0x46c   : > { %v660_v41 = vmul.f32 1.0986123, %v658_v10 }
 0x46e   : > { %v663_v43 = vmul.f32 1.442695, %v660_v41 }
 0x470   : > { %1953 = vpow2.f32 %v663_v43 }
 0x476   : > { %v1954_v44 = vpop.eup %1953 }
 0x477   : > { %v2429_v46 = vadd.f32 -1.0, %v1954_v44 }
 0x479   : > { %1955 = vrcp.f32 %v2429_v46  ;;  %v804_v59 = vand.u32 2147483648, %v2429_v46  ;;  %vm798_vm11 = vweird.f32 %v2429_v46  ;;  %v802_v60 = vand.u32 2147483647, %v2429_v46 }
 0x47a   : > { %1957 = vpow2.f32 %v621_v2  ;;  %v1422_v2 = vld [vmem:[%s2765_s10 + $0x70] sm:$0xff] }
 0x47b   : > { %vm803_vm13 = vcmp.eq.f32.partialorder %v802_v60, 8.507059e+37  ;;  %1429 = vmatpush.msra.mxu3 %v1422_v2 }
 0x47f   : > { %v1956_v51 = vpop.eup %1955 }
 0x480   : > { %v794_v56 = vmul.f32 %v1956_v51, %v2429_v46  ;;  %vm799_vm10 = vweird.f32 %v1956_v51  ;;  %v1958_v3 = vpop.eup %1957 }
 0x481   : > { %vm800_vm12 = vmor %vm798_vm11, %vm799_vm10 }
 0x482   : > { %v795_v57 = vsub.f32 1.0, %v794_v56  ;;  %v1372_v56 = vld [vmem:[%s2763_s8 + $0x18] sm:$0xff] }
 0x483   : > { %1395 = vmatpush.msra.mxu1 %v1372_v56 }
 0x484   : > { %v796_v58 = vmul.f32 %v1956_v51, %v795_v57  ;;  %v1370_v57 = vld [vmem:[%s2763_s8 + $0x8] sm:$0xff] }
 0x486   : > { %v797_v11 = vadd.f32 %v1956_v51, %v796_v58  ;;  %v1369_v58 = vld [vmem:[%s2763_s8] sm:$0xff] }
 0x488   : > { %v801_v61 = vsel %vm800_vm12, %v1956_v51, %v797_v11 }
 0x4c3   : > { %v940_v6 = vpop.f32.mrf.mxu2 }
 0x4c4   : > { %948 = vrot.lane.b32.xlu0 %v940_v6, %s2781_s26  ;;  %v625_v6 = vadd.f32 1.0, %v1958_v3 }
 0x4c5   : > { %v1079_v7 = vpop.f32.mrf.mxu1 }
 0x4c6   : > { %1087 = vrot.lane.b32.xlu2 %v1079_v7, %s2127_s29  ;;  %1959 = vrcp.f32 %v625_v6  ;;  %v638_v15 = vand.u32 2147483648, %v625_v6  ;;  %vm632_vm15 = vweird.f32 %v625_v6  ;;  %v636_v16 = vand.u32 2147483647, %v625_v6 }
 0x4c8   : > { %v639_v17 = vor.u32 1.1754944e-38, %v638_v15  ;;  %v1419_v15 = vld [vmem:[%s2765_s10 + $0x58] sm:$0xff] }
 0x4cb   : > { %v943_v8 = vpop.f32.mrf.mxu2 }
 0x4cc   : > { %950 = vrot.lane.b32.xlu1 %v943_v8, %s2781_s26  ;;  %v1960_v7 = vpop.eup %1959  ;;  %s2502_s26 = scalar_lea.vmem %s2772_s17, %s2807_s3 }
 0x4cd   : > { %v628_v8 = vmul.f32 %v1960_v7, %v625_v6  ;;  %vm633_vm14 = vweird.f32 %v1960_v7 }
 0x4ce   : > { %vm634_vm1 = vmor %vm632_vm15, %vm633_vm14 }
 0x4d5   : > { %v1082_v13 = vpop.f32.mrf.mxu1 }
 0x4d7   : > { %v1218_v12 = vpop.f32.mrf.mxu2 }
 0x4d8   : > { %1226 = vrot.lane.b32.xlu0 %v1218_v12, %s2128_s21  ;;  %v629_v12 = vsub.f32 1.0, %v628_v8  ;;  %v1421_v8 = vld [vmem:[%s2765_s10 + $0x68] sm:$0xff] }
 0x4d9   : > { %1430 = vmatpush.msra.mxu3 %v1421_v8 }
 0x4df   : > { %v1221_v14 = vpop.f32.mrf.mxu2 }
 0x4e0   : > { %1089 = vrot.lane.b32.xlu0 %v1082_v13, %s2127_s29  ;;  %1228 = vrot.lane.b32.xlu1 %v1221_v14, %s2128_s21  ;;  %v630_v13 = vmul.f32 %v1960_v7, %v629_v12  ;;  %s2785_s29 = sshll.u32 %s2247_s28, 6  ;;  %s1516_s21 = sand.u32 1, %s2247_s28  }
 0x4e1   : > { %s1555_s19 = scalar_lea.hbm %s2770_s15, %s2785_s29  ;;  %s2629_s22 = scalar_lea.sflag [#allocation6], %s1516_s21 }
 0x4e2   : > { %v631_v14 = vadd.f32 %v1960_v7, %v630_v13  ;;  %v1420_v13 = vld [vmem:[%s2765_s10 + $0x60] sm:$0xff] }
 0x4e3   : > { %1431 = vmatpush.msra.mxu3 %v1420_v13 }
 0x4e4   : > { %v635_v9 = vsel %vm634_vm1, %v1960_v7, %v631_v14 }
 0x4e5   : > { %1432 = vmatpush.msra.mxu3 %v1419_v15 }
 0x520   : > { %v1088_v20 = vpop.permute.xlu2 %1087 }
 0x536   : > { %v949_v19 = vpop.permute.xlu0 %948 }
 0x537   : > { %955 = vst.msk [vmem:[#allocation2] sm:$0xff] %vm954_vm3, %v949_v19  ;;  %v2131_v19 = vmov 32.0  }
 0x538   : > { %1094 = vst.msk [vmem:[#allocation2] sm:$0xff] %vm1093_vm4, %v1088_v20  ;;  %1961 = vrcp.f32 %v2131_v19  ;;  %v1417_v19 = vld [vmem:[%s2765_s10 + $0x48] sm:$0xff] }
 0x53e   : > { %v951_v21 = vpop.permute.xlu1 %950 }
 0x53f   : > { %956 = vst.msk [vmem:[#allocation2 + $0x8] sm:$0xff] %vm954_vm3, %v951_v21  ;;  %vm637_vm3 = vcmp.eq.f32.partialorder %v636_v16, 8.507059e+37  ;;  %v1962_v21 = vpop.eup %1961 }
 0x540   : > { %v640_v18 = vsel %vm637_vm3, %v639_v17, %v635_v9  ;;  %v1418_v9 = vld [vmem:[%s2765_s10 + $0x50] sm:$0xff] }
 0x541   : > { %v657_v20 = vadd.f32 1e-05, %v640_v18  ;;  %1433 = vmatpush.msra.mxu3 %v1418_v9 }
 0x543   : > { %1434 = vmatpush.msra.mxu3 %v1417_v19 }
 0x54a   : > { %v1227_v22 = vpop.permute.xlu0 %1226 }
 0x54b   : > { %1233 = vst.msk [vmem:[#allocation2] sm:$0xff] %vm1232_vm5, %v1227_v22  ;;  %v659_v22 = vmul.f32 1.0986123, %v657_v20  ;;  %v1911_v20 = vld [vmem:[%s2808_s6] ss:$0 sm:$0xff] }
 0x552   : > { %v1090_v23 = vpop.permute.xlu0 %1089  ;;  %v1229_v24 = vpop.permute.xlu1 %1228  ;;  %v1265_v25 = vld [vmem:[#allocation2] sm:$0xff] }
 0x553   : > { %1095 = vst.msk [vmem:[#allocation2 + $0x8] sm:$0xff] %vm1093_vm4, %v1090_v23  ;;  %1780 = vmatmul.msk.f32.vlgmr.msra.gmra.mxu0 %vm589_vm0, %v1265_v25  ;;  %v1315_v23 = vmul.f32 32.0, %v1962_v21  ;;  %vm1319_vm4 = vweird.f32 %v1962_v21 }
 0x554   : > { %1234 = vst.msk [vmem:[#allocation2 + $0x8] sm:$0xff] %vm1232_vm5, %v1229_v24  ;;  %v661_v24 = vmul.f32 1.442695, %v659_v22 }
 0x555   : > { %v1316_v25 = vsub.f32 1.0, %v1315_v23  ;;  %v1416_v23 = vld [vmem:[%s2765_s10 + $0x40] sm:$0xff] }
 0x556   : > { %1963 = vpow2.f32 %v661_v24  ;;  %1435 = vmatpush.msra.mxu3 %v1416_v23 }
 0x55b   : > { %v1266_v26 = vld [vmem:[#allocation2 + $0x8] sm:$0xff] }
 0x55c   : > { %1781 = vmatmul.msk.f32.gmra.mxu0 %vm589_vm0, %v1266_v26  ;;  %v1317_v26 = vmul.f32 %v1962_v21, %v1316_v25  ;;  %v1964_v27 = vpop.eup %1963 }
 0x55d   : > { %v1742_v29 = vadd.f32 -1.0, %v1964_v27  ;;  %v1415_v27 = vld [vmem:[%s2765_s10 + $0x38] sm:$0xff] }
 0x55e   : > { %v1318_v28 = vadd.f32 %v1962_v21, %v1317_v26  ;;  %v1912_v26 = vld [vmem:[%s2762_s7] ss:$0 sm:$0xff]  ;;  %1436 = vmatpush.msra.mxu3 %v1415_v27 }
 0x55f   : > { %1965 = vrcp.f32 %v1742_v29  ;;  %vm783_vm6 = vweird.f32 %v1742_v29 }
 0x560   : > { %v2457_v30 = vsel %vm1319_vm4, %v1962_v21, %v1318_v28 }
 0x565   : > { %v1966_v35 = vpop.eup %1965 }
 0x566   : > { %v779_v38 = vmul.f32 %v1966_v35, %v1742_v29  ;;  %vm784_vm5 = vweird.f32 %v1966_v35 }
 0x567   : > { %vm785_vm7 = vmor %vm783_vm6, %vm784_vm5 }
 0x568   : > { %v780_v10 = vsub.f32 1.0, %v779_v38 }
 0x56a   : > { %v781_v44 = vmul.f32 %v1966_v35, %v780_v10 }
 0x5d0   : > { %v1298_v47 = vpop.f32.mrf.mxu0 }
 0x5d1   : > { %v1299_v48 = vadd.f32 %v1910_v45, %v1298_v47  ;;  %v789_v47 = vand.u32 2147483648, %v1742_v29 }
 0x5d3   : > { %v2432_v49 = vadd.f32 %v1299_v48, %v2298_v4  ;;  %v787_v48 = vand.u32 2147483647, %v1742_v29 }
 0x5d5   : > { %v1308_v50 = vsel %vm589_vm0, %v2432_v49, 0.0  ;;  %vm788_vm8 = vcmp.eq.f32.partialorder %v787_v48, 8.507059e+37 }
 0x5d6   : > { %1309 = vadd.xlane.f32.xlu0 %v1308_v50  ;;  %v790_v50 = vor.u32 1.1754944e-38, %v789_v47 }
 0x5d9   : > { %v1301_v52 = vpop.f32.mrf.mxu0 }
 0x5da   : > { %v1302_v54 = vadd.f32 %v1910_v45, %v1301_v52  ;;  %v782_v45 = vadd.f32 %v1966_v35, %v781_v44  ;;  %v1409_v44 = vld [vmem:[%s2765_s10 + $0x8] sm:$0xff] }
 0x5dc   : > { %v2439_v55 = vadd.f32 %v1302_v54, %v2302_v5  ;;  %v805_v5 = vor.u32 1.1754944e-38, %v804_v59 }
 0x5de   : > { %v1311_v4 = vsel %vm589_vm0, %v2439_v55, 0.0  ;;  %v2447_v62 = vsel %vm803_vm13, %v805_v5, %v801_v61 }
 0x5df   : > { %1312 = vadd.xlane.f32.xlu1 %v1311_v4  ;;  %v813_v63 = vmul.f32 0.5, %v2447_v62  ;;  %v1371_v4 = vld [vmem:[%s2763_s8 + $0x10] sm:$0xff] }
 0x5e0   : > { %1396 = vmatpush.msra.mxu1 %v1371_v4  ;;  %v2134_v4 = vmov 98  }
 0x5e1   : > { %v2451_v0 = vmul.f32 %v813_v63, %v2447_v62 }
 0x5e2   : > { %1397 = vmatpush.msra.mxu1 %v1370_v57  ;;  %v1914_v57 = vld [vmem:[%s2766_s11] ss:$0 sm:$0xff] }
 0x5e4   : > { %1398 = vmatpush.msra.mxu1 %v1369_v58 }
 0x5f8   : > { %823 = vperm.xlu1 %1893, %v2451_v0  }
 0x600   : > { %1895 = vset.pattern.permute.xlu1 %v2130_v53 }
 0x601   : > { %962 = vperm.xlu1 %1895, %v2451_v0  }
 0x609   : > { %1897 = vset.pattern.permute.xlu1 %v2134_v4 }
 0x649   : > { %v1310_v31 = vpop.xlane.xlu0 %1309 }
 0x64a   : > { %v1321_v32 = vmul.f32 %v2457_v30, %v1310_v31  ;;  %v1414_v31 = vld [vmem:[%s2765_s10 + $0x30] sm:$0xff] }
 0x64b   : > { %1437 = vmatpush.msra.mxu3 %v1414_v31 }
 0x64c   : > { %v2461_v33 = vsub.f32 %v2432_v49, %v1321_v32  ;;  %v786_v49 = vsel %vm785_vm7, %v1966_v35, %v782_v45  ;;  %v1913_v45 = vld [vmem:[%s2764_s9] ss:$0 sm:$0xff] }
 0x64d   : > { %v2473_v51 = vsel %vm788_vm8, %v790_v50, %v786_v49 }
 0x64e   : > { %v1325_v34 = vmul.f32 %v2461_v33, %v2461_v33  ;;  %v812_v52 = vmul.f32 0.5, %v2473_v51  ;;  %v808_v2 = vmul.f32 0.3989423, %v2473_v51 }
 0x650   : > { %v1327_v36 = vsel %vm589_vm0, %v1325_v34, 0.0  ;;  %v2478_v54 = vmul.f32 %v812_v52, %v2473_v51  ;;  %v1413_v34 = vld [vmem:[%s2765_s10 + $0x28] sm:$0xff] }
 0x651   : > { %1328 = vadd.xlane.f32.xlu2 %v1327_v36  ;;  %v1412_v36 = vld [vmem:[%s2765_s10 + $0x20] sm:$0xff]  ;;  %1438 = vmatpush.msra.mxu3 %v1413_v34 }
 0x652   : > { %v1313_v37 = vpop.xlane.xlu1 %1312 }
 0x653   : > { %v1322_v39 = vmul.f32 %v2457_v30, %v1313_v37  ;;  %1439 = vmatpush.msra.mxu3 %v1412_v36 }
 0x655   : > { %v2468_v40 = vsub.f32 %v2439_v55, %v1322_v39  ;;  %v2133_v55 = vmov 99   ;;  %v1411_v39 = vld [vmem:[%s2765_s10 + $0x18] sm:$0xff] }
 0x656   : > { %1440 = vmatpush.msra.mxu3 %v1411_v39 }
 0x657   : > { %v1326_v41 = vmul.f32 %v2468_v40, %v2468_v40 }
 0x659   : > { %v1330_v43 = vsel %vm589_vm0, %v1326_v41, 0.0 }
 0x65a   : > { %1331 = vadd.xlane.f32.xlu0 %v1330_v43  ;;  %v1410_v43 = vld [vmem:[%s2765_s10 + $0x10] sm:$0xff] }
 0x65b   : > { %1441 = vmatpush.msra.mxu3 %v1410_v43 }
 0x65d   : > { %1442 = vmatpush.msra.mxu3 %v1409_v44 }
 0x669   : > { %669 = vrot.lane.b32.xlu2 %v1742_v29, %s2132_s25 }
 0x66e   : > { %818 = vperm.xlu0 %1892, %v2478_v54  }
 0x671   : > { %958 = vperm.xlu2 %1894, %v2478_v54  }
 0x676   : > { %1899 = vset.pattern.permute.xlu0 %v2133_v55 }
 0x677   : > { %1240 = vperm.xlu0 %1899, %v2451_v0  }
 0x679   : > { %1896 = vset.pattern.permute.xlu2 %v2134_v4 }
 0x67f   : > { %1904 = vset.pattern.permute.xlu0 %v2134_v4 }
 0x6c4   : > { %v1329_v11 = vpop.xlane.xlu2 %1328 }
 0x6c5   : > { %v1333_v59 = vmul.f32 %v1329_v11, %v2457_v30 }
 0x6c7   : > { %v1335_v60 = vadd.f32 1e-05, %v1333_v59 }
 0x6c9   : > { %1967 = vrsqrt.f32 %v1335_v60  ;;  %vm1343_vm11 = vweird.f32 %v1335_v60 }
 0x6cc   : > { %v670_v61 = vpop.permute.xlu2 %669 }
 0x6cd   : > { %676 = vst.msk [vmem:[%s2502_s26] sm:$0xff] %vm675_vm9, %v670_v61  ;;  %v1332_v5 = vpop.xlane.xlu0 %1331 }
 0x6ce   : > { %v1334_v63 = vmul.f32 %v1332_v5, %v2457_v30 }
 0x6cf   : > { %v1968_v3 = vpop.eup %1967 }
 0x6d0   : > { %v1338_v6 = vmul.f32 %v1968_v3, %v1335_v60  ;;  %v1336_v7 = vadd.f32 1e-05, %v1334_v63  ;;  %vm1344_vm10 = vweird.f32 %v1968_v3 }
 0x6d1   : > { %vm1345_vm12 = vmor %vm1343_vm11, %vm1344_vm10 }
 0x6d2   : > { %v1339_v12 = vmul.f32 %v1968_v3, %v1338_v6  ;;  %1969 = vrsqrt.f32 %v1336_v7  ;;  %vm1353_vm14 = vweird.f32 %v1336_v7 }
 0x6d4   : > { %v1340_v14 = vmul.f32 0.5, %v1339_v12  ;;  %v959_v51 = vpop.permute.xlu2 %958 }
 0x6d6   : > { %v1341_v16 = vsub.f32 1.5, %v1340_v14 }
 0x6d8   : > { %v1970_v17 = vpop.eup %1969  ;;  %v1342_v18 = vmul.f32 %v1968_v3, %v1341_v16 }
 0x6d9   : > { %v1348_v21 = vmul.f32 %v1970_v17, %v1336_v7  ;;  %vm1354_vm13 = vweird.f32 %v1970_v17 }
 0x6da   : > { %v1346_v22 = vsel %vm1345_vm12, %v1968_v3, %v1342_v18  ;;  %vm1355_vm15 = vmor %vm1353_vm14, %vm1354_vm13  ;;  %v2581_v3 = vmul.f32 0.3989423, %v2447_v62  ;;  %v824_v62 = vpop.permute.xlu1 %823 }
 0x6db   : > { %v1357_v24 = vmul.f32 %v1346_v22, %v2461_v33  ;;  %v1349_v25 = vmul.f32 %v1970_v17, %v1348_v21 }
 0x6dd   : > { %v1362_v28 = vmul.f32 %v1911_v20, %v1357_v24  ;;  %v1350_v29 = vmul.f32 0.5, %v1349_v25 }
 0x6df   : > { %v1351_v32 = vsub.f32 1.5, %v1350_v29  ;;  %v1367_v33 = vadd.f32 %v1912_v26, %v1362_v28 }
 0x6e0   : > { %v819_v9 = vpop.permute.xlu0 %818 }
 0x6e1   : > { %v1352_v35 = vmul.f32 %v1970_v17, %v1351_v32  ;;  %1782 = vmatmul.msk.f32.vlgmr.msra.gmra.mxu1 %vm589_vm0, %v1367_v33 }
 0x6e3   : > { %v1356_v37 = vsel %vm1355_vm15, %v1970_v17, %v1352_v35 }
 0x6e4   : > { %v1358_v38 = vmul.f32 %v1356_v37, %v2468_v40  ;;  %v1408_v40 = vld [vmem:[%s2765_s10] sm:$0xff] }
 0x6e5   : > { %1443 = vmatpush.msra.mxu3 %v1408_v40 }
 0x6e6   : > { %v1363_v10 = vmul.f32 %v1911_v20, %v1358_v38 }
 0x6e8   : > { %v1368_v41 = vadd.f32 %v1912_v26, %v1363_v10 }
 0x6ea   : > { %1783 = vmatmul.msk.f32.gmra.mxu1 %vm589_vm0, %v1368_v41 }
 0x75e   : > { %v1400_v47 = vpop.f32.mrf.mxu1 }
 0x75f   : > { %v1401_v48 = vadd.f32 %v1913_v45, %v1400_v47 }
 0x761   : > { %v1406_v49 = vmax.f32 %v1401_v48, 0.0 }
 0x763   : > { %1444 = vmatmul.f32.vlgmr.msra.gmra.mxu3 %v1406_v49 }
 0x767   : > { %v1403_v50 = vpop.f32.mrf.mxu1 }
 0x768   : > { %v1404_v52 = vadd.f32 %v1913_v45, %v1403_v50 }
 0x76a   : > { %v1407_v56 = vmax.f32 %v1404_v52, 0.0 }
 0x76c   : > { %1447 = vmatmul.f32.gmra.mxu3 %v1407_v56 }
 0x7e6   : > { %v1445_v58 = vpop.f32.mrf.mxu3 }
 0x7e7   : > { %v1446_v11 = vadd.f32 %v1914_v57, %v1445_v58 }
 0x7e9   : > { %v1451_v59 = vadd.f32 %v1446_v11, %v1367_v33 }
 0x7eb   : > { %v1455_v60 = vsel %vm589_vm0, %v1451_v59, 0.0 }
 0x7ec   : > { %1456 = vadd.xlane.f32.xlu1 %v1455_v60 }
 0x7ef   : > { %v1448_v61 = vpop.f32.mrf.mxu3 }
 0x7f0   : > { %v1449_v5 = vadd.f32 %v1914_v57, %v1448_v61 }
 0x7f2   : > { %v1452_v63 = vadd.f32 %v1449_v5, %v1368_v41 }
 0x7f4   : > { %v1458_v1 = vsel %vm589_vm0, %v1452_v63, 0.0 }
 0x7f5   : > { %1459 = vadd.xlane.f32.xlu2 %v1458_v1 }
 0x805   : > { %1101 = vperm.xlu1 %1897, %v2451_v0   ;;  %v963_v0 = vpop.permute.xlu1 %962 }
 0x80d   : > { %1900 = vset.pattern.permute.xlu1 %v2129_v42  ;;  %1097 = vperm.xlu2 %1896, %v2478_v54  }
 0x80e   : > { %834 = vperm.xlu1 %1900, %v808_v2  }
 0x815   : > { %1898 = vset.pattern.permute.xlu2 %v2133_v55 }
 0x816   : > { %1236 = vperm.xlu2 %1898, %v2478_v54   ;;  %1902 = vset.pattern.permute.xlu1 %v2130_v53 }
 0x817   : > { %972 = vperm.xlu1 %1902, %v808_v2  }
 0x81e   : > { %1901 = vset.pattern.permute.xlu2 %v2129_v42 }
 0x81f   : > { %839 = vperm.xlu2 %1901, %v2581_v3   ;;  %1905 = vset.pattern.permute.xlu1 %v2134_v4 }
 0x820   : > { %1115 = vperm.xlu1 %1905, %v2581_v3  }
 0x827   : > { %1903 = vset.pattern.permute.xlu2 %v2130_v53 }
 0x828   : > { %976 = vperm.xlu2 %1903, %v2581_v3   ;;  %1907 = vset.pattern.permute.xlu1 %v2133_v55 }
 0x830   : > { %1906 = vset.pattern.permute.xlu2 %v2133_v55 }
 0x831   : > { %1250 = vperm.xlu2 %1906, %v808_v2  }
 0x839   : > { %671 = vrot.lane.b32.xlu2 %v2429_v46, %s2132_s25  ;;  %s2809_s25 = sld [smem:[#allocation16_spill]] }
 0x83f   : > { %s2810_s3 = smov %s2809_s25  ;;  %v580_v46 = vld [vmem:[%s2809_s25 + $0x8] sm:$0xff]  ;;  %s1558_s25 = sshll.u32 %s1555_s19, 4  ;;  %s1559_s25 = int_to_ptr.hbm [resolvable:$true] %s1558_s25 }
 0x840   : > { %v2604_v14 = vsub.f32 0.0, %v580_v46  ;;  %v579_v15 = vld [vmem:[%s2810_s3] sm:$0xff]  ;;  %s2005_s20 = sshra.s32 %s1559_s25, 4  ;;  %s2006_s20 = int_to_ptr.hbm [resolvable:$true] %s2005_s20 }
 0x841   : > { %v2612_v18 = vsub.f32 0.0, %v579_v15  ;;  %s2007_s3 = scalar_lea.hbm %s2006_s20, 64  ;;  %p2012_p0 = scmp.lt.s32.totalorder %s2006_s20, %s2770_s15 }
 0x842   : > { %v827_v20 = vmul.f32 %v824_v62, %v2604_v14  ;;  %v966_v26 = vmul.f32 %v963_v0, %v2604_v14  ;;  %p2008_p11 = scmp.ne.s32.totalorder %s2006_s20, %s2007_s3  ;;  %p2013_p1 = scmp.lt.s32.totalorder %s2011_s18, %s2007_s3 }
 0x843   : > { %v826_v21 = vmul.f32 %v819_v9, %v2612_v18  ;;  %v965_v27 = vmul.f32 %v959_v51, %v2612_v18 }
 0x844   : > { %v830_v22 = vmul.f32 1.442695, %v827_v20  ;;  %v969_v28 = vmul.f32 1.442695, %v966_v26  ;;  %p2009_p12 = pnand %p2008_p11, %p2266_p5  ;;  %p2014_p2 = por %p2013_p1, %p2012_p0 }
 0x845   : > { %v828_v23 = vmul.f32 1.442695, %v826_v21  ;;  %v967_v31 = vmul.f32 1.442695, %v965_v27 }
 0x846   : > { %1971 = vpow2.f32 %v830_v22  ;;  %p2010_p13 = pneg %p2009_p12 }
 0x847   : > { %1973 = vpow2.f32 %v828_v23 }
 0x848   : > { %1975 = vpow2.f32 %v969_v28  ;;  %p2015_p3 = pnand %p2014_p2, %p2010_p13 }
 0x84c   : > { %v1972_v29 = vpop.eup %1971 }
 0x84d   : > { %v1974_v32 = vpop.eup %1973 }
 0x85f   : > { %v1457_v42 = vpop.xlane.xlu1 %1456 }
 0x860   : > { %v1461_v54 = vmul.f32 %v1457_v42, %v2457_v30 }
 0x862   : > { %v2593_v6 = vsub.f32 %v1451_v59, %v1461_v54 }
 0x864   : > { %v1465_v53 = vmul.f32 %v2593_v6, %v2593_v6 }
 0x866   : > { %v1467_v7 = vsel %vm589_vm0, %v1465_v53, 0.0 }
 0x867   : > { %1468 = vadd.xlane.f32.xlu0 %v1467_v7 }
 0x868   : > { %v1460_v8 = vpop.xlane.xlu2 %1459 }
 0x869   : > { %v1462_v12 = vmul.f32 %v1460_v8, %v2457_v30 }
 0x86b   : > { %v2602_v13 = vsub.f32 %v1452_v63, %v1462_v12 }
 0x86d   : > { %v1466_v16 = vmul.f32 %v2602_v13, %v2602_v13 }
 0x86f   : > { %v1470_v17 = vsel %vm589_vm0, %v1466_v16, 0.0 }
 0x870   : > { %v2614_v19 = vpop.permute.xlu2 %1097  ;;  %1471 = vadd.xlane.f32.xlu1 %v1470_v17 }
 0x877   : > { %v1102_v24 = vpop.permute.xlu1 %1101 }
 0x878   : > { %v1237_v25 = vpop.permute.xlu2 %1236 }
 0x879   : > { %v1243_v37 = vmul.f32 %v1237_v25, %v2612_v18 }
 0x87b   : > { %1111 = vperm.xlu0 %1904, %v808_v2  }
 0x880   : > { %v840_v33 = vpop.permute.xlu2 %839  ;;  %v835_v34 = vpop.permute.xlu1 %834 }
 0x881   : > { %v843_v35 = vmul.f32 %v1972_v29, %v840_v33  ;;  %v842_v36 = vmul.f32 %v1974_v32, %v835_v34 }
 0x882   : > { %2018 = shalt.err (!%p2015_p3)
}
 0x883   : > { %s2786_s21 = smov 128   ;;  %s2811_s4 = smov 8   ;;  %1977 = vpow2.f32 %v967_v31  ;;  %1908 = vset.pattern.permute.xlu0 %v2133_v55  ;;  %v1105_v38 = vmul.f32 %v1102_v24, %v2604_v14  ;;  %v1245_v39 = vmul.f32 1.442695, %v1243_v37  ;;  %v1976_v10 = vpop.eup %1975  ;;  %v1241_v57 = vpop.permute.xlu0 %1240  ;;  %v1104_v60 = vmul.f32 %v2614_v19, %v2612_v18 }
 0x884   : > { %1803 = dma.vmem_to_hbm [thread:$0]  (%p2266_p5), %s1557_s2, 1024, %s1559_s25, %s2629_s22, %s2786_s21, %s2786_s21, %s2811_s4   ;;  %v1244_v54 = vmul.f32 %v1241_v57, %v2604_v14 }
 0x885   : > { %s2812_s23 = sshll.u32 %s2351_s0, 6  ;;  %v1108_v41 = vmul.f32 1.442695, %v1105_v38  ;;  %1979 = vpow2.f32 %v1245_v39  ;;  %v1106_v61 = vmul.f32 1.442695, %v1104_v60  ;;  %s1733_s25 = sshll.u32 %s2351_s0, 4 }
 0x886   : > { %s2647_s30 = scalar_lea.vmem [#allocation7], %s2812_s23  ;;  %v1247_v16 = vmul.f32 1.442695, %v1244_v54  ;;  %v1916_v14 = vld [vmem:[%s2768_s13] ss:$0 sm:$0xff]  ;;  %s1797_s20 = sshll.u32 %s2247_s28, 4 }
 0x887   : > { %847 = vst.msk [vmem:[%s2647_s30 + $0x8] sm:$0xff] %vm718_vm2, %v843_v35  ;;  %1981 = vpow2.f32 %v1108_v41  ;;  %s2813_s18 = sshll.u32 %s2247_s28, 6  ;;  %s2687_s3 = scalar_lea.vmem [#allocation3], %s1733_s25 }
 0x888   : > { %846 = vst.msk [vmem:[%s2647_s30] sm:$0xff] %vm718_vm2, %v842_v36  ;;  %v977_v43 = vpop.permute.xlu2 %976  ;;  %s1538_s21 = scalar_lea.hbm %s2769_s14, %s1797_s20  ;;  %s1573_s5 = sshll.u32 %s2647_s30, 4  ;;  %s1574_s5 = int_to_ptr.vmem [resolvable:$true] %s1573_s5 }
 0x889   : > { %v1978_v44 = vpop.eup %1977  ;;  %v980_v40 = vmul.f32 %v1976_v10, %v977_v43  ;;  %1254 = vperm.xlu1 %1907, %v2581_v3   ;;  %v973_v45 = vpop.permute.xlu1 %972  ;;  %s1539_s25 = sshll.u32 %s2687_s3, 4  ;;  %s2699_s25 = int_to_ptr.vmem [resolvable:$true] %s1539_s25 }
 0x88a   : > { %v979_v47 = vmul.f32 %v1978_v44, %v973_v45 }
 0x88b   : > { %1759 = vst.msk [vmem:[%s2647_s30 + $0x18] sm:$0xff] %vm718_vm2, %v980_v40  ;;  %v1980_v55 = vpop.eup %1979 }
 0x88c   : > { %1758 = vst.msk [vmem:[%s2647_s30 + $0x10] sm:$0xff] %vm718_vm2, %v979_v47 }
 0x88d   : > { %v1982_v50 = vpop.eup %1981 }
 0x890   : > { %v1251_v48 = vpop.permute.xlu2 %1250 }
 0x891   : > { %v1257_v49 = vmul.f32 %v1980_v55, %v1251_v48 }
 0x892   : > { %v1116_v52 = vpop.permute.xlu1 %1115 }
 0x893   : > { %1778 = vst.msk [vmem:[%s2647_s30 + $0x30] sm:$0xff] %vm718_vm2, %v1257_v49  ;;  %v1119_v56 = vmul.f32 %v1982_v50, %v1116_v52 }
 0x895   : > { %1769 = vst.msk [vmem:[%s2647_s30 + $0x28] sm:$0xff] %vm718_vm2, %v1119_v56 }
 0x898   : > { %v672_v4 = vpop.permute.xlu2 %671 }
 0x899   : > { %677 = vst.msk [vmem:[%s2502_s26 + $0x8] sm:$0xff] %vm675_vm9, %v672_v4  ;;  %s1572_s26 = scalar_lea.hbm %s2771_s16, %s2813_s18  ;;  %s1541_s18 = sshll.u32 %s1538_s21, 4  ;;  %s2701_s18 = int_to_ptr.hbm [resolvable:$true] %s1541_s18 }
 0x89a   : > { %s1575_s28 = sshll.u32 %s1572_s26, 4  ;;  %s2039_s26 = scalar_lea.hbm %s2771_s16, 128  ;;  %s1576_s28 = int_to_ptr.hbm [resolvable:$true] %s1575_s28 }
 0x89b   : > { %s2033_s20 = sshra.s32 %s1576_s28, 4  ;;  %s2034_s20 = int_to_ptr.hbm [resolvable:$true] %s2033_s20 }
 0x89c   : > { %s2035_s19 = scalar_lea.hbm %s2034_s20, 64  ;;  %p2040_p9 = scmp.lt.s32.totalorder %s2034_s20, %s2771_s16 }
 0x89d   : > { %p2036_p4 = scmp.ne.s32.totalorder %s2034_s20, %s2035_s19  ;;  %p2041_p10 = scmp.lt.s32.totalorder %s2039_s26, %s2035_s19 }
 0x89f   : > { %p2037_p7 = pnand %p2036_p4, %p2266_p5  ;;  %p2042_p11 = por %p2041_p10, %p2040_p9 }
 0x8a1   : > { %p2038_p8 = pneg %p2037_p7 }
 0x8a3   : > { %p2043_p12 = pnand %p2042_p11, %p2038_p8 }
 0x8da   : > { %v1469_v58 = vpop.xlane.xlu0 %1468 }
 0x8db   : > { %v1473_v11 = vmul.f32 %v1469_v58, %v2457_v30 }
 0x8dd   : > { %v1475_v59 = vadd.f32 1e-05, %v1473_v11 }
 0x8df   : > { %1983 = vrsqrt.f32 %v1475_v59  ;;  %vm1483_vm3 = vweird.f32 %v1475_v59 }
 0x8e0   : > { %1985 = vpow2.f32 %v1106_v61 }
 0x8e3   : > { %v1472_v5 = vpop.xlane.xlu1 %1471 }
 0x8e4   : > { %v1474_v63 = vmul.f32 %v1472_v5, %v2457_v30  ;;  %v1915_v30 = vld [vmem:[%s2767_s12] ss:$0 sm:$0xff] }
 0x8e5   : > { %v1984_v1 = vpop.eup %1983 }
 0x8e6   : > { %v1478_v2 = vmul.f32 %v1984_v1, %v1475_v59  ;;  %v1476_v3 = vadd.f32 1e-05, %v1474_v63  ;;  %vm1484_vm1 = vweird.f32 %v1984_v1  ;;  %v1986_v51 = vpop.eup %1985 }
 0x8e7   : > { %vm1485_vm4 = vmor %vm1483_vm3, %vm1484_vm1 }
 0x8e8   : > { %v1479_v62 = vmul.f32 %v1984_v1, %v1478_v2  ;;  %1987 = vrsqrt.f32 %v1476_v3  ;;  %vm1493_vm6 = vweird.f32 %v1476_v3 }
 0x8e9   : > { %1989 = vpow2.f32 %v1247_v16 }
 0x8ea   : > { %v1480_v0 = vmul.f32 0.5, %v1479_v62 }
 0x8ec   : > { %v1481_v42 = vsub.f32 1.5, %v1480_v0 }
 0x8ed   : > { %v1112_v53 = vpop.permute.xlu0 %1111 }
 0x8ee   : > { %v1988_v7 = vpop.eup %1987  ;;  %v1482_v8 = vmul.f32 %v1984_v1, %v1481_v42  ;;  %v1118_v12 = vmul.f32 %v1986_v51, %v1112_v53 }
 0x8ef   : > { %v1488_v46 = vmul.f32 %v1988_v7, %v1476_v3  ;;  %vm1494_vm5 = vweird.f32 %v1988_v7  ;;  %v1990_v24 = vpop.eup %1989 }
 0x8f0   : > { %v1486_v15 = vsel %vm1485_vm4, %v1984_v1, %v1482_v8  ;;  %1768 = vst.msk [vmem:[%s2647_s30 + $0x20] sm:$0xff] %vm718_vm2, %v1118_v12  ;;  %vm1495_vm7 = vmor %vm1493_vm6, %vm1494_vm5 }
 0x8f1   : > { %v1497_v9 = vmul.f32 %v1486_v15, %v2593_v6  ;;  %v1489_v17 = vmul.f32 %v1988_v7, %v1488_v46 }
 0x8f3   : > { %v1502_v18 = vmul.f32 %v1915_v30, %v1497_v9  ;;  %v1490_v19 = vmul.f32 0.5, %v1489_v17 }
 0x8f5   : > { %v1507_v20 = vadd.f32 %v1916_v14, %v1502_v18  ;;  %v1491_v21 = vsub.f32 1.5, %v1490_v19 }
 0x8f7   : > { %v1492_v22 = vmul.f32 %v1988_v7, %v1491_v21  ;;  %1509 = vst.msk [vmem:[%s2687_s3] sm:$0xff] %vm589_vm0, %v1507_v20 }
 0x8f9   : > { %v1496_v6 = vsel %vm1495_vm7, %v1988_v7, %v1492_v22 }
 0x8fa   : > { %v1498_v23 = vmul.f32 %v1496_v6, %v2602_v13 }
 0x8fb   : > { %v1255_v25 = vpop.permute.xlu1 %1254 }
 0x8fc   : > { %v1503_v26 = vmul.f32 %v1915_v30, %v1498_v23  ;;  %v1258_v27 = vmul.f32 %v1990_v24, %v1255_v25 }
 0x8fe   : > { %v1508_v28 = vadd.f32 %v1916_v14, %v1503_v26  ;;  %1779 = vst.msk [vmem:[%s2647_s30 + $0x38] sm:$0xff] %vm718_vm2, %v1258_v27 }
 0x8ff   : > { %2046 = shalt.err (!%p2043_p12)
}
 0x900   : > { %s2814_s30 = smov 128   ;;  %1510 = vst.msk [vmem:[%s2687_s3 + $0x8] sm:$0xff] %vm589_vm0, %v1508_v28  ;;  %s1512_s23 = scalar_lea.sflag [#allocation4], %s2351_s0 }
 0x901   : > { %1804 = dma.vmem_to_hbm [thread:$0]  (%p2266_p5), %s1574_s5, 1024, %s1576_s28, %s2629_s22, %s2814_s30, %s2814_s30, %s2811_s4  }
 0x902   : > { %s2061_s21 = sshra.s32 %s2701_s18, 4  ;;  %s2067_s29 = scalar_lea.hbm %s2769_s14, 32  ;;  %s2062_s21 = int_to_ptr.hbm [resolvable:$true] %s2061_s21 }
 0x903   : > { %s2063_s20 = scalar_lea.hbm %s2062_s21, 16  ;;  %p2068_p2 = scmp.lt.s32.totalorder %s2062_s21, %s2769_s14 }
 0x904   : > { %p2064_p13 = scmp.ne.s32.totalorder %s2062_s21, %s2063_s20  ;;  %p2069_p3 = scmp.lt.s32.totalorder %s2067_s29, %s2063_s20 }
 0x906   : > { %p2065_p0 = pnand %p2064_p13, %p2266_p5  ;;  %p2070_p4 = por %p2069_p3, %p2068_p2 }
 0x908   : > { %p2066_p1 = pneg %p2065_p0 }
 0x90a   : > { %p2071_p7 = pnand %p2070_p4, %p2066_p1 }
 0x90c   : > { %2074 = shalt.err (!%p2071_p7)
}
 0x90d   : > { %1802 = dma.vmem_to_hbm [thread:$0]  (%p2266_p5), %s2699_s25, 256, %s2701_s18, %s1512_s23, %s2814_s30, %s2814_s30, %s2811_s4  }
 0x90e PF: > { %p1818_p8 = scmp.ge.s32.totalorder %s2113_s27, 2  ;;  %s1593_s0 = sand.u32 1, %s2101_s24  }
 0x90f   : > { %s1594_s6 = scalar_lea.sflag [#allocation4], %s1593_s0 }
 0x910   : > { %p1809_p9 = pnand %p1818_p8, %p2270_p6 }
 0x912   : > { %p1810_p10 = pneg %p1809_p9 }
 0x914   : > { %2092 = dma.done.wait (%p1810_p10), %s1594_s6, 256  }
 0x915   : > { %2094 = vsyncadd (%p1810_p10), %s1594_s6, 4294967040  ;;  %s2816_s1 = sadd.s32 4294967294, %s2113_s27  }
 0x916   : > { %s1603_s22 = sand.u32 1, %s2816_s1  }
 0x917   : > { %s1604_s3 = scalar_lea.sflag [#allocation6], %s1603_s22 }
 0x918   : > { %2096 = dma.done.wait (%p1810_p10), %s1604_s3, 2048  }
 0x919   : > { %2098 = vsyncadd (%p1810_p10), %s1604_s3, 4294965248  ;;  %s2817_s27 = sld [smem:[#allocation12_spill]] }
 0x91a   : > { %s2818_s24 = sld [smem:[#allocation10_spill]] }
 0x91b   : > { %s2819_s25 = sld [smem:[#allocation11_spill]] }
 0x91c   : > { %s2820_s26 = sld [smem:[#allocation13_spill]] }
 0x91f   : > { %p31_p5 = scmp.ge.s32.totalorder %s2817_s27, 4  }
 0x921   :  { %33 = sbr.rel (!%p31_p5) target bundleno = 13 (0xd), region = 161 }
 0x926   :  { %1628 = vsyncpa [#allocation4], 1 }
 0x927   :  { %1630 = vsyncpa [#allocation4 + $0x1], 1 }
 0x928   :  { %1631 = vsyncpa [#allocation6], 1 }
 0x929   :  { %1633 = vsyncpa [#allocation6 + $0x1], 1 }

</bundles_post_ra>
